<compile_context>
chip_gen: v7x
topology: tpu7x:2x2x1
jax: 0.10.0
libtpu: 0.0.40
codegen_flags: <defaults>
</compile_context>

<pallas_src>
import functools

import jax
import jax.numpy as jnp
from jax import lax
from jax.experimental import pallas as pl
from jax.experimental.pallas import tpu as pltpu

# ---- module-consistent sizes -------------------------------------------------
EMBED_DIM = 32                 # arg.embed_dim
NUM_SYMBOLS = 20               # num_symbols (pad_idx == NUM_SYMBOLS)
VOCAB = NUM_SYMBOLS + 1
NEIGHBOR_K = 30                # hardcoded in Matcher.neighbor_encoder (.view(B,1,30))
PROCESS_STEPS = 2              # arg.process_steps
D_MODEL = 2 * EMBED_DIM        # 64
D_INNER = 2 * D_MODEL          # 128 (SupportEncoder hidden)
LSTM_HID = 2 * D_MODEL         # 128 (QueryEncoder LSTMCell hidden)
LSTM_GATES = 4 * LSTM_HID      # 512
LN_EPS = 0.001


def _align8(n):
  return (n + 7) & ~7


# ---- param slab A (lane width 128): embeddings, attention, SupportEncoder ----
ROW_EMB = 0                                   # rows [0, VOCAB): [emb | emb_var]
ROW_ATTW = _align8(ROW_EMB + VOCAB)           # 24: block-diag att W (rel | ent)
ROW_MISC = _align8(ROW_ATTW + D_MODEL)        # 88: biases / u / layernorm
ROW_P1W = _align8(ROW_MISC + 7)               # 96: proj1_W^T (64,128)
ROW_P1B = ROW_P1W + D_MODEL                   # 160
ROW_P2W = _align8(ROW_P1B + 1)                # 168: proj2_W^T (128,64)
ROW_P2B = ROW_P2W + D_INNER                   # 296
PA_ROWS = _align8(ROW_P2B + 1)                # 304

# ---- param slab B (lane width 512): LSTMCell ---------------------------------
ROWB_WIH = 0                                  # rows [0, 64)
ROWB_WHH = ROWB_WIH + D_MODEL                 # rows [64, 192)
ROWB_BIAS = ROWB_WHH + LSTM_HID               # 192 (bih + bhh combined)
PB_ROWS = _align8(ROWB_BIAS + 1)              # 200


# =============================================================================
# Fused kernel: neighbor_encoder + SupportEncoder(support & query) + QueryEncoder
# One grid step == one task/episode.
# =============================================================================
def _matcher_fused_kernel(ids_ref, support_ref, pa_ref, pb_ref,
                          out_main_ref, out_enc_ref, xall_ref,
                          *, batch, k_neigh, few, process_step, eps):
  D = EMBED_DIM
  dm = D_MODEL
  hid = LSTM_HID
  bk = batch * k_neigh
  f32 = jnp.float32

  # ------------------ 1) neighbor_encoder (whole batch at once) ---------------
  rel = ids_ref[:, 0:1]                                           # (bk, 1) int32
  ent = ids_ref[:, 1:2]
  iota_v = lax.broadcasted_iota(jnp.int32, (bk, VOCAB), 1)
  oh_rel = (rel == iota_v).astype(f32)                            # (bk, VOCAB)
  oh_ent = (ent == iota_v).astype(f32)
  # NOTE: ids must lie in [0, VOCAB-1] (nn.Embedding would raise otherwise).
  emb_tbl = pa_ref[ROW_EMB:ROW_EMB + VOCAB, 0:2 * D]              # [emb | emb_var]
  comb_rel = jnp.dot(oh_rel, emb_tbl, preferred_element_type=f32)  # (bk, 64)
  comb_ent = jnp.dot(oh_ent, emb_tbl, preferred_element_type=f32)
  # Reference pools symbol_emb(entities) (NOT the var table) in BOTH branches.
  ent_e = comb_ent[:, 0:D]                                        # (bk, 32)

  # Block-diagonal fused attention weights: lanes 0:32 branch-1, 32:64 var branch.
  attWr = pa_ref[ROW_ATTW:ROW_ATTW + dm, 0:dm]                    # (64, 64)
  attWe = pa_ref[ROW_ATTW:ROW_ATTW + dm, dm:2 * dm]
  wb = pa_ref[ROW_MISC:ROW_MISC + 1, 0:dm]                        # [W_b | var W_b]
  u_mat = pa_ref[ROW_MISC + 1:ROW_MISC + 3, 0:dm]                 # (2, 64): [u1|0],[0|u2]
  u_b = pa_ref[ROW_MISC + 3:ROW_MISC + 5, 0:1]                    # (2, 1)

  h_comb = jnp.tanh(jnp.dot(comb_rel, attWr, preferred_element_type=f32)
                    + jnp.dot(comb_ent, attWe, preferred_element_type=f32)
                    + wb)                                         # (bk, 64)
  logits = lax.dot_general(u_mat, h_comb, (((1,), (1,)), ((), ())),
                           preferred_element_type=f32) + u_b      # (2, bk)

  # Per-batch-row (segment) softmax over the K neighbors, with per-segment max.
  row_b = lax.broadcasted_iota(jnp.int32, (batch, bk), 0)
  col_b = lax.broadcasted_iota(jnp.int32, (batch, bk), 1)
  seg = jnp.logical_and(col_b >= row_b * k_neigh,
                        col_b < (row_b + 1) * k_neigh)            # (batch, bk)

  def seg_softmax_pool(logit_row):                                # (1, bk) -> (batch, D)
    m = jnp.where(seg, logit_row, f32(-1e30))                     # (batch, bk)
    mx = jnp.max(m, axis=-1, keepdims=True)
    ew = jnp.exp(m - mx)                                          # 0 outside segment
    num = jnp.dot(ew, ent_e, preferred_element_type=f32)          # (batch, D)
    den = jnp.sum(ew, axis=-1, keepdims=True)
    return jnp.tanh(num * pl.reciprocal(den, approx=True))

  out = seg_softmax_pool(logits[0:1, :])                          # (batch, 32)
  out_var = seg_softmax_pool(logits[1:2, :])
  out_main_ref[:, 0:D] = out                                      # query_raw low half
  out_main_ref[:, D:2 * D] = out_var                              # query_raw high half

  # --------- 2) SupportEncoder on [support_raw ; query_raw] (no concats) ------
  xall_ref[0:few, :] = support_ref[...]
  xall_ref[few:few + batch, 0:D] = out
  xall_ref[few:few + batch, D:2 * D] = out_var
  x_all = xall_ref[...]                                           # (few+batch, 64)

  w1 = pa_ref[ROW_P1W:ROW_P1W + dm, :]                            # (64, 128)
  b1 = pa_ref[ROW_P1B:ROW_P1B + 1, :]
  w2 = pa_ref[ROW_P2W:ROW_P2W + D_INNER, 0:dm]                    # (128, 64)
  b2 = pa_ref[ROW_P2B:ROW_P2B + 1, 0:dm]
  ln_a = pa_ref[ROW_MISC + 5:ROW_MISC + 6, 0:dm]
  ln_b = pa_ref[ROW_MISC + 6:ROW_MISC + 7, 0:dm]

  h1 = jnp.maximum(jnp.dot(x_all, w1, preferred_element_type=f32) + b1, 0.0)
  z = jnp.dot(h1, w2, preferred_element_type=f32) + b2 + x_all    # residual
  mu = jnp.mean(z, axis=-1, keepdims=True)
  # torch.std is unbiased (ddof=1); eps added outside the sqrt (reference).
  var = jnp.sum((z - mu) ** 2, axis=-1, keepdims=True) * (1.0 / (dm - 1))
  enc = (z - mu) * pl.reciprocal(jnp.sqrt(var) + eps, approx=True) * ln_a + ln_b
  out_enc_ref[...] = enc                                          # support_enc || query_enc

  S = enc[0:few, :]                                               # (few, 64)
  q = enc[few:few + batch, :]                                     # (batch, 64)

  # ------------- 3) QueryEncoder: LSTMCell loop + attention over support ------
  if process_step == 0:
    out_main_ref[:, dm:2 * dm] = q
    return

  wih = pb_ref[ROWB_WIH:ROWB_WIH + dm, :]                         # (64, 512)
  whh_h = pb_ref[ROWB_WHH:ROWB_WHH + dm, :]                       # (64, 512)
  whh_r = pb_ref[ROWB_WHH + dm:ROWB_WHH + hid, :]                 # (64, 512)
  bias = pb_ref[ROWB_BIAS:ROWB_BIAS + 1, :]                       # bih + bhh
  # Loop-invariant input projection hoisted out of the loop.
  qW = jnp.dot(q, wih, preferred_element_type=f32) + bias         # (batch, 512)

  def step(_, carry):
    h_prev, r_prev, c_prev = carry                                # (B,64)(B,64)(B,128)
    gates = (qW
             + jnp.dot(h_prev, whh_h, preferred_element_type=f32)
             + jnp.dot(r_prev, whh_r, preferred_element_type=f32))
    i_g = jax.nn.sigmoid(gates[:, 0:hid])
    f_g = jax.nn.sigmoid(gates[:, hid:2 * hid])
    g_g = jnp.tanh(gates[:, 2 * hid:3 * hid])
    o_g = jax.nn.sigmoid(gates[:, 3 * hid:4 * hid])
    c_new = f_g * c_prev + i_g * g_g
    h_cell = o_g * jnp.tanh(c_new)                                # (B, 128)
    h_new = q + h_cell[:, 0:dm]                                   # (B, 64)
    logit = lax.dot_general(h_new, S, (((1,), (1,)), ((), ())),
                            preferred_element_type=f32)           # (B, few)
    logit = logit - jnp.max(logit, axis=-1, keepdims=True)
    e = jnp.exp(logit)
    attn = e * pl.reciprocal(jnp.sum(e, axis=-1, keepdims=True), approx=True)
    r_new = jnp.dot(attn, S, preferred_element_type=f32)          # (B, 64)
    return (h_new, r_new, c_new)

  h0 = jnp.zeros((batch, dm), f32)
  r0 = jnp.zeros((batch, dm), f32)
  c0 = jnp.zeros((batch, hid), f32)
  h_fin, _, _ = lax.fori_loop(0, process_step, step, (h0, r0, c0), unroll=True)
  out_main_ref[:, dm:2 * dm] = h_fin                              # q_final


# =============================================================================
# Host wrapper: grid over tasks, param slabs as grid-invariant blocks
# =============================================================================
def matcher_forward(slab_a, slab_b, connections, num_neighbors, support_raw,
                    process_step=PROCESS_STEPS):
  """connections: (T, B, K, 3) or (B, K, 3); columns = [rel_id, ent_id, confidence]."""
  del num_neighbors  # computed but unused in the reference forward path
  squeeze_task = False
  if connections.ndim == 3:
    connections = connections[None]
    support_raw = support_raw[None]
    squeeze_task = True
  T, B, K, _ = connections.shape
  _, FEW, dm = support_raw.shape
  assert dm == D_MODEL and K == NEIGHBOR_K
  # Merge rel/ent ids into a single (T, B*K, 2) int32 tensor (one DMA per task).
  # confidences (connections[..., 2]) are repeated in torch but never used.
  ids = connections[..., :2].astype(jnp.int32).reshape(T, B * K, 2)

  kernel = functools.partial(_matcher_fused_kernel, batch=B, k_neigh=K,
                             few=FEW, process_step=process_step, eps=LN_EPS)

  out_main, out_enc = pl.pallas_call(
      kernel,
      grid=(T,),
      in_specs=[
          pl.BlockSpec((None, B * K, 2), lambda t: (t, 0, 0)),
          pl.BlockSpec((None, FEW, D_MODEL), lambda t: (t, 0, 0)),
          pl.BlockSpec((PA_ROWS, 128), lambda t: (0, 0)),          # grid-invariant
          pl.BlockSpec((PB_ROWS, LSTM_GATES), lambda t: (0, 0)),   # grid-invariant
      ],
      out_specs=[
          pl.BlockSpec((None, B, 2 * D_MODEL), lambda t: (t, 0, 0)),
          pl.BlockSpec((None, FEW + B, D_MODEL), lambda t: (t, 0, 0)),
      ],
      out_shape=[
          jax.ShapeDtypeStruct((T, B, 2 * D_MODEL), jnp.float32),  # [out|out_var|q_final]
          jax.ShapeDtypeStruct((T, FEW + B, D_MODEL), jnp.float32),  # enc_all
      ],
      scratch_shapes=[pltpu.VMEM((FEW + B, D_MODEL), jnp.float32)],
      compiler_params=pltpu.CompilerParams(dimension_semantics=("parallel",)),
  )(ids, support_raw, slab_a, slab_b)

  res = dict(
      out=out_main[..., :EMBED_DIM],          # Matcher.neighbor_encoder outputs
      out_var=out_main[..., EMBED_DIM:D_MODEL],
      query_raw=out_main[..., :D_MODEL],      # out || out_var
      q_final=out_main[..., D_MODEL:],        # QueryEncoder(support_enc, query_enc)
      support_enc=out_enc[:, :FEW, :],        # SupportEncoder(support_raw)
      query_enc=out_enc[:, FEW:, :],          # SupportEncoder(query_raw)
  )
  if squeeze_task:
    res = {k: v[0] for k, v in res.items()}
  return res


# =============================================================================
# deterministic parameter construction (shapes from Matcher.__init__) + packing
# =============================================================================
def init_params(seed=0):
  D = EMBED_DIM
  keys = iter(jax.random.split(jax.random.PRNGKey(seed), 32))

  def nrm(shape, scale=0.1):
    return (scale * jax.random.normal(next(keys), shape)).astype(jnp.float32)

  emb = nrm((VOCAB, D)).at[NUM_SYMBOLS].set(0.0)          # padding_idx row
  emb_var = nrm((VOCAB, D)).at[NUM_SYMBOLS].set(0.0)
  z = lambda *s: jnp.zeros(s, jnp.float32)
  return dict(
      symbol_emb=emb, symbol_var_emb=emb_var,
      # neighbor attention (weights stored pre-transposed: (in, out))
      neigh_att_W_t=nrm((D_MODEL, D)), neigh_att_W_b=z(1, D),
      neigh_att_u_row=nrm((1, D)), neigh_att_u_b=z(1, 1),
      neigh_var_att_W_t=nrm((D_MODEL, D)), neigh_var_att_W_b=z(1, D),
      neigh_var_att_u_row=nrm((1, D)), neigh_var_att_u_b=z(1, 1),
      # SupportEncoder
      proj1_W_t=nrm((D_MODEL, D_INNER)), proj1_b=z(1, D_INNER),
      proj2_W_t=nrm((D_INNER, D_MODEL)), proj2_b=z(1, D_MODEL),
      ln_a=jnp.ones((1, D_MODEL), jnp.float32), ln_b=z(1, D_MODEL),
      # QueryEncoder LSTMCell (gate order i, f, g, o)
      lstm_Wih_t=nrm((D_MODEL, LSTM_GATES)), lstm_Whh_t=nrm((LSTM_HID, LSTM_GATES)),
      lstm_bih=z(1, LSTM_GATES), lstm_bhh=z(1, LSTM_GATES),
  )


def pack_params(p):
  """One-time host-side packing of all parameters into two DMA slabs."""
  D = EMBED_DIM
  A = jnp.zeros((PA_ROWS, 128), jnp.float32)
  # embedding tables: lanes 0:32 = symbol_emb, 32:64 = symbol_var_emb
  A = A.at[ROW_EMB:ROW_EMB + VOCAB, 0:D].set(p['symbol_emb'])
  A = A.at[ROW_EMB:ROW_EMB + VOCAB, D:2 * D].set(p['symbol_var_emb'])
  # block-diagonal fused attention weights
  W1, W2 = p['neigh_att_W_t'], p['neigh_var_att_W_t']     # (64, 32) each
  A = A.at[ROW_ATTW:ROW_ATTW + D, 0:D].set(W1[0:D])                         # rel, branch 1
  A = A.at[ROW_ATTW + D:ROW_ATTW + 2 * D, D:2 * D].set(W2[0:D])             # rel, var branch
  A = A.at[ROW_ATTW:ROW_ATTW + D, D_MODEL:D_MODEL + D].set(W1[D:2 * D])     # ent, branch 1
  A = A.at[ROW_ATTW + D:ROW_ATTW + 2 * D, D_MODEL + D:2 * D_MODEL].set(W2[D:2 * D])
  # misc: biases, u vectors, layernorm
  A = A.at[ROW_MISC, 0:D].set(p['neigh_att_W_b'][0])
  A = A.at[ROW_MISC, D:2 * D].set(p['neigh_var_att_W_b'][0])
  A = A.at[ROW_MISC + 1, 0:D].set(p['neigh_att_u_row'][0])
  A = A.at[ROW_MISC + 2, D:2 * D].set(p['neigh_var_att_u_row'][0])
  A = A.at[ROW_MISC + 3, 0].set(p['neigh_att_u_b'][0, 0])
  A = A.at[ROW_MISC + 4, 0].set(p['neigh_var_att_u_b'][0, 0])
  A = A.at[ROW_MISC + 5, 0:D_MODEL].set(p['ln_a'][0])
  A = A.at[ROW_MISC + 6, 0:D_MODEL].set(p['ln_b'][0])
  # SupportEncoder
  A = A.at[ROW_P1W:ROW_P1W + D_MODEL, :].set(p['proj1_W_t'])
  A = A.at[ROW_P1B, :].set(p['proj1_b'][0])
  A = A.at[ROW_P2W:ROW_P2W + D_INNER, 0:D_MODEL].set(p['proj2_W_t'])
  A = A.at[ROW_P2B, 0:D_MODEL].set(p['proj2_b'][0])

  B_ = jnp.zeros((PB_ROWS, LSTM_GATES), jnp.float32)
  B_ = B_.at[ROWB_WIH:ROWB_WIH + D_MODEL, :].set(p['lstm_Wih_t'])
  B_ = B_.at[ROWB_WHH:ROWB_WHH + LSTM_HID, :].set(p['lstm_Whh_t'])
  B_ = B_.at[ROWB_BIAS, :].set(p['lstm_bih'][0] + p['lstm_bhh'][0])
  return A, B_


if __name__ == "__main__":
  T, B, FEW = 8, 4, 3
  params = init_params(0)
  slab_a, slab_b = pack_params(params)

  k1, k2, k3, k4 = jax.random.split(jax.random.PRNGKey(0), 4)
  rel_ids = jax.random.randint(k1, (T, B, NEIGHBOR_K), 0, NUM_SYMBOLS)
  ent_ids = jax.random.randint(k2, (T, B, NEIGHBOR_K), 0, NUM_SYMBOLS)
  conf = jax.random.uniform(k3, (T, B, NEIGHBOR_K))
  connections = jnp.stack([rel_ids.astype(jnp.float32),
                           ent_ids.astype(jnp.float32),
                           conf], axis=-1)                        # (T, B, 30, 3)
  num_neighbors = jnp.full((T, B), NEIGHBOR_K, jnp.int32)
  support_raw = 0.1 * jax.random.normal(k4, (T, FEW, D_MODEL), jnp.float32)

  results = matcher_forward(slab_a, slab_b, connections, num_neighbors,
                            support_raw, process_step=PROCESS_STEPS)
  jax.block_until_ready(results)
  print("KERNEL_OK")
</pallas_src>

<mosaic_0001>
module attributes {stable_mosaic.version = 11 : i64} {
  func.func @_matcher_fused_kernel(%arg0: i32, %arg1: memref<1x120x2xi32, #tpu.memory_space<vmem>>, %arg2: memref<1x3x64xf32, #tpu.memory_space<vmem>>, %arg3: memref<304x128xf32, #tpu.memory_space<vmem>>, %arg4: memref<200x512xf32, #tpu.memory_space<vmem>>, %arg5: memref<1x4x128xf32, #tpu.memory_space<vmem>>, %arg6: memref<1x7x64xf32, #tpu.memory_space<vmem>>, %arg7: memref<7x64xf32, #tpu.memory_space<vmem>>) attributes {dimension_semantics = [#tpu.dimension_semantics<parallel>], iteration_bounds = array<i64: 8>, scalar_prefetch = 0 : i64, scratch_operands = 1 : i64, tpu.core_type = #tpu.core_type<tc>, window_params = [{transform_indices = @transform_0, window_bounds = array<i64: 1, 120, 2>}, {transform_indices = @transform_1, window_bounds = array<i64: 1, 3, 64>}, {pipeline_mode = #tpu.pipeline_mode<synchronous>, transform_indices = @transform_2, window_bounds = array<i64: 304, 128>}, {pipeline_mode = #tpu.pipeline_mode<synchronous>, transform_indices = @transform_3, window_bounds = array<i64: 200, 512>}, {transform_indices = @transform_4, window_bounds = array<i64: 1, 4, 128>}, {transform_indices = @transform_5, window_bounds = array<i64: 1, 7, 64>}]} {
    %c0 = arith.constant 0 : index
    %c0_0 = arith.constant 0 : index
    %c0_1 = arith.constant 0 : index
    %0 = vector.load %arg1[%c0, %c0_0, %c0_1] : memref<1x120x2xi32, #tpu.memory_space<vmem>>, vector<1x120x1xi32>
    %1 = vector.shape_cast %0 : vector<1x120x1xi32> to vector<120x1xi32>
    %c0_2 = arith.constant 0 : index
    %c0_3 = arith.constant 0 : index
    %c1 = arith.constant 1 : index
    %2 = vector.load %arg1[%c0_2, %c0_3, %c1] : memref<1x120x2xi32, #tpu.memory_space<vmem>>, vector<1x120x1xi32>
    %3 = vector.shape_cast %2 : vector<1x120x1xi32> to vector<120x1xi32>
    %4 = tpu.iota {dimensions = array<i32: 1>} : vector<120x21xi32>
    %5 = vector.broadcast %1 : vector<120x1xi32> to vector<120x21xi32>
    %6 = arith.cmpi eq, %5, %4 : vector<120x21xi32>
    %7 = arith.extui %6 : vector<120x21xi1> to vector<120x21xi32>
    %8 = arith.sitofp %7 : vector<120x21xi32> to vector<120x21xf32>
    %9 = vector.broadcast %3 : vector<120x1xi32> to vector<120x21xi32>
    %10 = arith.cmpi eq, %9, %4 : vector<120x21xi32>
    %11 = arith.extui %10 : vector<120x21xi1> to vector<120x21xi32>
    %12 = arith.sitofp %11 : vector<120x21xi32> to vector<120x21xf32>
    %c0_4 = arith.constant 0 : index
    %c0_5 = arith.constant 0 : index
    %13 = vector.load %arg3[%c0_4, %c0_5] : memref<304x128xf32, #tpu.memory_space<vmem>>, vector<21x64xf32>
    %cst = arith.constant dense<0.000000e+00> : vector<120x64xf32>
    %14 = tpu.matmul %8, %13, %cst {dimension_numbers = #tpu.dot_dimension_numbers<[1], [0], [0], [1], [0, 0, 1, 1], [], []>} : vector<120x21xf32>, vector<21x64xf32>, vector<120x64xf32> -> vector<120x64xf32>
    %cst_6 = arith.constant dense<0.000000e+00> : vector<120x64xf32>
    %15 = tpu.matmul %12, %13, %cst_6 {dimension_numbers = #tpu.dot_dimension_numbers<[1], [0], [0], [1], [0, 0, 1, 1], [], []>} : vector<120x21xf32>, vector<21x64xf32>, vector<120x64xf32> -> vector<120x64xf32>
    %16 = vector.extract_strided_slice %15 {offsets = [0, 0], sizes = [120, 32], strides = [1, 1]} : vector<120x64xf32> to vector<120x32xf32>
    %c24 = arith.constant 24 : index
    %c0_7 = arith.constant 0 : index
    %17 = vector.load %arg3[%c24, %c0_7] : memref<304x128xf32, #tpu.memory_space<vmem>>, vector<64x64xf32>
    %c24_8 = arith.constant 24 : index
    %c64 = arith.constant 64 : index
    %18 = vector.load %arg3[%c24_8, %c64] : memref<304x128xf32, #tpu.memory_space<vmem>>, vector<64x64xf32>
    %c88 = arith.constant 88 : index
    %c0_9 = arith.constant 0 : index
    %19 = vector.load %arg3[%c88, %c0_9] : memref<304x128xf32, #tpu.memory_space<vmem>>, vector<1x64xf32>
    %c89 = arith.constant 89 : index
    %c0_10 = arith.constant 0 : index
    %20 = vector.load %arg3[%c89, %c0_10] : memref<304x128xf32, #tpu.memory_space<vmem>>, vector<2x64xf32>
    %c91 = arith.constant 91 : index
    %c0_11 = arith.constant 0 : index
    %21 = vector.load %arg3[%c91, %c0_11] : memref<304x128xf32, #tpu.memory_space<vmem>>, vector<2x1xf32>
    %cst_12 = arith.constant dense<0.000000e+00> : vector<120x64xf32>
    %22 = tpu.matmul %14, %17, %cst_12 {dimension_numbers = #tpu.dot_dimension_numbers<[1], [0], [0], [1], [0, 0, 1, 1], [], []>} : vector<120x64xf32>, vector<64x64xf32>, vector<120x64xf32> -> vector<120x64xf32>
    %cst_13 = arith.constant dense<0.000000e+00> : vector<120x64xf32>
    %23 = tpu.matmul %15, %18, %cst_13 {dimension_numbers = #tpu.dot_dimension_numbers<[1], [0], [0], [1], [0, 0, 1, 1], [], []>} : vector<120x64xf32>, vector<64x64xf32>, vector<120x64xf32> -> vector<120x64xf32>
    %24 = arith.addf %22, %23 : vector<120x64xf32>
    %25 = vector.broadcast %19 : vector<1x64xf32> to vector<120x64xf32>
    %26 = arith.addf %24, %25 : vector<120x64xf32>
    %27 = math.tanh %26 : vector<120x64xf32>
    %cst_14 = arith.constant dense<0.000000e+00> : vector<2x120xf32>
    %28 = tpu.matmul %20, %27, %cst_14 {dimension_numbers = #tpu.dot_dimension_numbers<[1], [1], [0], [0], [0, 0, 1, 0], [], []>} : vector<2x64xf32>, vector<120x64xf32>, vector<2x120xf32> -> vector<2x120xf32>
    %29 = vector.broadcast %21 : vector<2x1xf32> to vector<2x120xf32>
    %30 = arith.addf %28, %29 : vector<2x120xf32>
    %31 = tpu.iota {dimensions = array<i32: 0>} : vector<4x120xi32>
    %32 = tpu.iota {dimensions = array<i32: 1>} : vector<4x120xi32>
    %c30_i32 = arith.constant 30 : i32
    %33 = vector.broadcast %c30_i32 : i32 to vector<4x120xi32>
    %34 = arith.muli %31, %33 : vector<4x120xi32>
    %35 = arith.cmpi sge, %32, %34 : vector<4x120xi32>
    %c1_i32 = arith.constant 1 : i32
    %36 = vector.broadcast %c1_i32 : i32 to vector<4x120xi32>
    %37 = arith.addi %31, %36 : vector<4x120xi32>
    %c30_i32_15 = arith.constant 30 : i32
    %38 = vector.broadcast %c30_i32_15 : i32 to vector<4x120xi32>
    %39 = arith.muli %37, %38 : vector<4x120xi32>
    %40 = arith.cmpi slt, %32, %39 : vector<4x120xi32>
    %41 = arith.andi %35, %40 : vector<4x120xi1>
    %42 = vector.extract_strided_slice %30 {offsets = [0, 0], sizes = [1, 120], strides = [1, 1]} : vector<2x120xf32> to vector<1x120xf32>
    %cst_16 = arith.constant -1.000000e+30 : f32
    %43 = vector.shape_cast %42 : vector<1x120xf32> to vector<1x120xf32>
    %44 = vector.broadcast %43 : vector<1x120xf32> to vector<4x120xf32>
    %45 = vector.broadcast %cst_16 : f32 to vector<4x120xf32>
    %46 = arith.select %41, %44, %45 : vector<4x120xi1>, vector<4x120xf32>
    %cst_17 = arith.constant dense<0xFF800000> : vector<4xf32>
    %47 = vector.multi_reduction <maximumf>, %46, %cst_17 [1] : vector<4x120xf32> to vector<4xf32>
    %48 = vector.shape_cast %47 : vector<4xf32> to vector<4x1xf32>
    %49 = vector.broadcast %48 : vector<4x1xf32> to vector<4x120xf32>
    %50 = arith.subf %46, %49 : vector<4x120xf32>
    %51 = math.exp %50 : vector<4x120xf32>
    %cst_18 = arith.constant dense<0.000000e+00> : vector<4x32xf32>
    %52 = tpu.matmul %51, %16, %cst_18 {dimension_numbers = #tpu.dot_dimension_numbers<[1], [0], [0], [1], [0, 0, 1, 1], [], []>} : vector<4x120xf32>, vector<120x32xf32>, vector<4x32xf32> -> vector<4x32xf32>
    %cst_19 = arith.constant dense<0.000000e+00> : vector<4xf32>
    %53 = vector.multi_reduction <add>, %51, %cst_19 [1] : vector<4x120xf32> to vector<4xf32>
    %54 = vector.shape_cast %53 : vector<4xf32> to vector<4x1xf32>
    %55 = tpu.reciprocal %54 {approx = true} : vector<4x1xf32> -> vector<4x1xf32>
    %56 = vector.broadcast %55 : vector<4x1xf32> to vector<4x32xf32>
    %57 = arith.mulf %52, %56 : vector<4x32xf32>
    %58 = math.tanh %57 : vector<4x32xf32>
    %59 = vector.extract_strided_slice %30 {offsets = [1, 0], sizes = [1, 120], strides = [1, 1]} : vector<2x120xf32> to vector<1x120xf32>
    %cst_20 = arith.constant -1.000000e+30 : f32
    %60 = vector.shape_cast %59 : vector<1x120xf32> to vector<1x120xf32>
    %61 = vector.broadcast %60 : vector<1x120xf32> to vector<4x120xf32>
    %62 = vector.broadcast %cst_20 : f32 to vector<4x120xf32>
    %63 = arith.select %41, %61, %62 : vector<4x120xi1>, vector<4x120xf32>
    %cst_21 = arith.constant dense<0xFF800000> : vector<4xf32>
    %64 = vector.multi_reduction <maximumf>, %63, %cst_21 [1] : vector<4x120xf32> to vector<4xf32>
    %65 = vector.shape_cast %64 : vector<4xf32> to vector<4x1xf32>
    %66 = vector.broadcast %65 : vector<4x1xf32> to vector<4x120xf32>
    %67 = arith.subf %63, %66 : vector<4x120xf32>
    %68 = math.exp %67 : vector<4x120xf32>
    %cst_22 = arith.constant dense<0.000000e+00> : vector<4x32xf32>
    %69 = tpu.matmul %68, %16, %cst_22 {dimension_numbers = #tpu.dot_dimension_numbers<[1], [0], [0], [1], [0, 0, 1, 1], [], []>} : vector<4x120xf32>, vector<120x32xf32>, vector<4x32xf32> -> vector<4x32xf32>
    %cst_23 = arith.constant dense<0.000000e+00> : vector<4xf32>
    %70 = vector.multi_reduction <add>, %68, %cst_23 [1] : vector<4x120xf32> to vector<4xf32>
    %71 = vector.shape_cast %70 : vector<4xf32> to vector<4x1xf32>
    %72 = tpu.reciprocal %71 {approx = true} : vector<4x1xf32> -> vector<4x1xf32>
    %73 = vector.broadcast %72 : vector<4x1xf32> to vector<4x32xf32>
    %74 = arith.mulf %69, %73 : vector<4x32xf32>
    %75 = math.tanh %74 : vector<4x32xf32>
    %c0_24 = arith.constant 0 : index
    %c0_25 = arith.constant 0 : index
    %c0_26 = arith.constant 0 : index
    %76 = vector.load %arg5[%c0_24, %c0_25, %c0_26] : memref<1x4x128xf32, #tpu.memory_space<vmem>>, vector<1x4x32xf32>
    %77 = vector.shape_cast %76 : vector<1x4x32xf32> to vector<4x32xf32>
    %78 = vector.shape_cast %58 : vector<4x32xf32> to vector<1x4x32xf32>
    tpu.vector_store %arg5[%c0_24, %c0_25, %c0_26], %78 {strides = array<i32>} : memref<1x4x128xf32, #tpu.memory_space<vmem>>, vector<1x4x32xf32>,
    %c0_27 = arith.constant 0 : index
    %c0_28 = arith.constant 0 : index
    %c32 = arith.constant 32 : index
    %79 = vector.load %arg5[%c0_27, %c0_28, %c32] : memref<1x4x128xf32, #tpu.memory_space<vmem>>, vector<1x4x32xf32>
    %80 = vector.shape_cast %79 : vector<1x4x32xf32> to vector<4x32xf32>
    %81 = vector.shape_cast %75 : vector<4x32xf32> to vector<1x4x32xf32>
    tpu.vector_store %arg5[%c0_27, %c0_28, %c32], %81 {strides = array<i32>} : memref<1x4x128xf32, #tpu.memory_space<vmem>>, vector<1x4x32xf32>,
    %c0_29 = arith.constant 0 : index
    %c0_30 = arith.constant 0 : index
    %c0_31 = arith.constant 0 : index
    %82 = vector.load %arg2[%c0_29, %c0_30, %c0_31] : memref<1x3x64xf32, #tpu.memory_space<vmem>>, vector<1x3x64xf32>
    %83 = vector.shape_cast %82 : vector<1x3x64xf32> to vector<3x64xf32>
    %c0_32 = arith.constant 0 : index
    %c0_33 = arith.constant 0 : index
    %84 = vector.load %arg7[%c0_32, %c0_33] : memref<7x64xf32, #tpu.memory_space<vmem>>, vector<3x64xf32>
    tpu.vector_store %arg7[%c0_32, %c0_33], %83 {strides = array<i32>} : memref<7x64xf32, #tpu.memory_space<vmem>>, vector<3x64xf32>,
    %c3 = arith.constant 3 : index
    %c0_34 = arith.constant 0 : index
    %85 = vector.load %arg7[%c3, %c0_34] : memref<7x64xf32, #tpu.memory_space<vmem>>, vector<4x32xf32>
    tpu.vector_store %arg7[%c3, %c0_34], %58 {strides = array<i32>} : memref<7x64xf32, #tpu.memory_space<vmem>>, vector<4x32xf32>,
    %c3_35 = arith.constant 3 : index
    %c32_36 = arith.constant 32 : index
    %86 = vector.load %arg7[%c3_35, %c32_36] : memref<7x64xf32, #tpu.memory_space<vmem>>, vector<4x32xf32>
    tpu.vector_store %arg7[%c3_35, %c32_36], %75 {strides = array<i32>} : memref<7x64xf32, #tpu.memory_space<vmem>>, vector<4x32xf32>,
    %c0_37 = arith.constant 0 : index
    %c0_38 = arith.constant 0 : index
    %87 = vector.load %arg7[%c0_37, %c0_38] : memref<7x64xf32, #tpu.memory_space<vmem>>, vector<7x64xf32>
    %c96 = arith.constant 96 : index
    %c0_39 = arith.constant 0 : index
    %88 = vector.load %arg3[%c96, %c0_39] : memref<304x128xf32, #tpu.memory_space<vmem>>, vector<64x128xf32>
    %c160 = arith.constant 160 : index
    %c0_40 = arith.constant 0 : index
    %89 = vector.load %arg3[%c160, %c0_40] : memref<304x128xf32, #tpu.memory_space<vmem>>, vector<1x128xf32>
    %c168 = arith.constant 168 : index
    %c0_41 = arith.constant 0 : index
    %90 = vector.load %arg3[%c168, %c0_41] : memref<304x128xf32, #tpu.memory_space<vmem>>, vector<128x64xf32>
    %c296 = arith.constant 296 : index
    %c0_42 = arith.constant 0 : index
    %91 = vector.load %arg3[%c296, %c0_42] : memref<304x128xf32, #tpu.memory_space<vmem>>, vector<1x64xf32>
    %c93 = arith.constant 93 : index
    %c0_43 = arith.constant 0 : index
    %92 = vector.load %arg3[%c93, %c0_43] : memref<304x128xf32, #tpu.memory_space<vmem>>, vector<1x64xf32>
    %c94 = arith.constant 94 : index
    %c0_44 = arith.constant 0 : index
    %93 = vector.load %arg3[%c94, %c0_44] : memref<304x128xf32, #tpu.memory_space<vmem>>, vector<1x64xf32>
    %cst_45 = arith.constant dense<0.000000e+00> : vector<7x128xf32>
    %94 = tpu.matmul %87, %88, %cst_45 {dimension_numbers = #tpu.dot_dimension_numbers<[1], [0], [0], [1], [0, 0, 1, 1], [], []>} : vector<7x64xf32>, vector<64x128xf32>, vector<7x128xf32> -> vector<7x128xf32>
    %95 = vector.broadcast %89 : vector<1x128xf32> to vector<7x128xf32>
    %96 = arith.addf %94, %95 : vector<7x128xf32>
    %cst_46 = arith.constant 0.000000e+00 : f32
    %97 = vector.broadcast %cst_46 : f32 to vector<7x128xf32>
    %98 = arith.maximumf %96, %97 : vector<7x128xf32>
    %cst_47 = arith.constant dense<0.000000e+00> : vector<7x64xf32>
    %99 = tpu.matmul %98, %90, %cst_47 {dimension_numbers = #tpu.dot_dimension_numbers<[1], [0], [0], [1], [0, 0, 1, 1], [], []>} : vector<7x128xf32>, vector<128x64xf32>, vector<7x64xf32> -> vector<7x64xf32>
    %100 = vector.broadcast %91 : vector<1x64xf32> to vector<7x64xf32>
    %101 = arith.addf %99, %100 : vector<7x64xf32>
    %102 = arith.addf %101, %87 : vector<7x64xf32>
    %cst_48 = arith.constant dense<0.000000e+00> : vector<7xf32>
    %103 = vector.multi_reduction <add>, %102, %cst_48 [1] : vector<7x64xf32> to vector<7xf32>
    %104 = vector.shape_cast %103 : vector<7xf32> to vector<7x1xf32>
    %cst_49 = arith.constant 6.400000e+01 : f32
    %105 = vector.broadcast %cst_49 : f32 to vector<7x1xf32>
    %106 = arith.divf %104, %105 : vector<7x1xf32>
    %107 = vector.broadcast %106 : vector<7x1xf32> to vector<7x64xf32>
    %108 = arith.subf %102, %107 : vector<7x64xf32>
    %109 = arith.mulf %108, %108 : vector<7x64xf32>
    %cst_50 = arith.constant dense<0.000000e+00> : vector<7xf32>
    %110 = vector.multi_reduction <add>, %109, %cst_50 [1] : vector<7x64xf32> to vector<7xf32>
    %111 = vector.shape_cast %110 : vector<7xf32> to vector<7x1xf32>
    %cst_51 = arith.constant 0.0158730168 : f32
    %112 = vector.broadcast %cst_51 : f32 to vector<7x1xf32>
    %113 = arith.mulf %111, %112 : vector<7x1xf32>
    %114 = vector.broadcast %106 : vector<7x1xf32> to vector<7x64xf32>
    %115 = arith.subf %102, %114 : vector<7x64xf32>
    %116 = math.sqrt %113 : vector<7x1xf32>
    %cst_52 = arith.constant 1.000000e-03 : f32
    %117 = vector.broadcast %cst_52 : f32 to vector<7x1xf32>
    %118 = arith.addf %116, %117 : vector<7x1xf32>
    %119 = tpu.reciprocal %118 {approx = true} : vector<7x1xf32> -> vector<7x1xf32>
    %120 = vector.broadcast %119 : vector<7x1xf32> to vector<7x64xf32>
    %121 = arith.mulf %115, %120 : vector<7x64xf32>
    %122 = vector.broadcast %92 : vector<1x64xf32> to vector<7x64xf32>
    %123 = arith.mulf %121, %122 : vector<7x64xf32>
    %124 = vector.broadcast %93 : vector<1x64xf32> to vector<7x64xf32>
    %125 = arith.addf %123, %124 : vector<7x64xf32>
    %c0_53 = arith.constant 0 : index
    %c0_54 = arith.constant 0 : index
    %c0_55 = arith.constant 0 : index
    %126 = vector.load %arg6[%c0_53, %c0_54, %c0_55] : memref<1x7x64xf32, #tpu.memory_space<vmem>>, vector<1x7x64xf32>
    %127 = vector.shape_cast %126 : vector<1x7x64xf32> to vector<7x64xf32>
    %128 = vector.shape_cast %125 : vector<7x64xf32> to vector<1x7x64xf32>
    tpu.vector_store %arg6[%c0_53, %c0_54, %c0_55], %128 {strides = array<i32>} : memref<1x7x64xf32, #tpu.memory_space<vmem>>, vector<1x7x64xf32>,
    %129 = vector.extract_strided_slice %125 {offsets = [0, 0], sizes = [3, 64], strides = [1, 1]} : vector<7x64xf32> to vector<3x64xf32>
    %130 = vector.extract_strided_slice %125 {offsets = [3, 0], sizes = [4, 64], strides = [1, 1]} : vector<7x64xf32> to vector<4x64xf32>
    %c0_56 = arith.constant 0 : index
    %c0_57 = arith.constant 0 : index
    %131 = vector.load %arg4[%c0_56, %c0_57] : memref<200x512xf32, #tpu.memory_space<vmem>>, vector<64x512xf32>
    %c64_58 = arith.constant 64 : index
    %c0_59 = arith.constant 0 : index
    %132 = vector.load %arg4[%c64_58, %c0_59] : memref<200x512xf32, #tpu.memory_space<vmem>>, vector<64x512xf32>
    %c128 = arith.constant 128 : index
    %c0_60 = arith.constant 0 : index
    %133 = vector.load %arg4[%c128, %c0_60] : memref<200x512xf32, #tpu.memory_space<vmem>>, vector<64x512xf32>
    %c192 = arith.constant 192 : index
    %c0_61 = arith.constant 0 : index
    %134 = vector.load %arg4[%c192, %c0_61] : memref<200x512xf32, #tpu.memory_space<vmem>>, vector<1x512xf32>
    %cst_62 = arith.constant dense<0.000000e+00> : vector<4x512xf32>
    %135 = tpu.matmul %130, %131, %cst_62 {dimension_numbers = #tpu.dot_dimension_numbers<[1], [0], [0], [1], [0, 0, 1, 1], [], []>} : vector<4x64xf32>, vector<64x512xf32>, vector<4x512xf32> -> vector<4x512xf32>
    %136 = vector.broadcast %134 : vector<1x512xf32> to vector<4x512xf32>
    %137 = arith.addf %135, %136 : vector<4x512xf32>
    %cst_63 = arith.constant 0.000000e+00 : f32
    %138 = vector.broadcast %cst_63 : f32 to vector<4x64xf32>
    %cst_64 = arith.constant 0.000000e+00 : f32
    %139 = vector.broadcast %cst_64 : f32 to vector<4x64xf32>
    %cst_65 = arith.constant 0.000000e+00 : f32
    %140 = vector.broadcast %cst_65 : f32 to vector<4x128xf32>
    %c0_i32 = arith.constant 0 : i32
    %cst_66 = arith.constant dense<0.000000e+00> : vector<4x512xf32>
    %141 = tpu.matmul %138, %132, %cst_66 {dimension_numbers = #tpu.dot_dimension_numbers<[1], [0], [0], [1], [0, 0, 1, 1], [], []>} : vector<4x64xf32>, vector<64x512xf32>, vector<4x512xf32> -> vector<4x512xf32>
    %142 = arith.addf %137, %141 : vector<4x512xf32>
    %cst_67 = arith.constant dense<0.000000e+00> : vector<4x512xf32>
    %143 = tpu.matmul %139, %133, %cst_67 {dimension_numbers = #tpu.dot_dimension_numbers<[1], [0], [0], [1], [0, 0, 1, 1], [], []>} : vector<4x64xf32>, vector<64x512xf32>, vector<4x512xf32> -> vector<4x512xf32>
    %144 = arith.addf %142, %143 : vector<4x512xf32>
    %145 = vector.extract_strided_slice %144 {offsets = [0, 0], sizes = [4, 128], strides = [1, 1]} : vector<4x512xf32> to vector<4x128xf32>
    %146 = arith.negf %145 : vector<4x128xf32>
    %147 = math.exp %146 : vector<4x128xf32>
    %cst_68 = arith.constant 1.000000e+00 : f32
    %148 = vector.broadcast %cst_68 : f32 to vector<4x128xf32>
    %149 = arith.addf %148, %147 : vector<4x128xf32>
    %150 = arith.divf %148, %149 : vector<4x128xf32>
    %151 = vector.extract_strided_slice %144 {offsets = [0, 128], sizes = [4, 128], strides = [1, 1]} : vector<4x512xf32> to vector<4x128xf32>
    %152 = arith.negf %151 : vector<4x128xf32>
    %153 = math.exp %152 : vector<4x128xf32>
    %cst_69 = arith.constant 1.000000e+00 : f32
    %154 = vector.broadcast %cst_69 : f32 to vector<4x128xf32>
    %155 = arith.addf %154, %153 : vector<4x128xf32>
    %156 = arith.divf %154, %155 : vector<4x128xf32>
    %157 = vector.extract_strided_slice %144 {offsets = [0, 256], sizes = [4, 128], strides = [1, 1]} : vector<4x512xf32> to vector<4x128xf32>
    %158 = math.tanh %157 : vector<4x128xf32>
    %159 = vector.extract_strided_slice %144 {offsets = [0, 384], sizes = [4, 128], strides = [1, 1]} : vector<4x512xf32> to vector<4x128xf32>
    %160 = arith.negf %159 : vector<4x128xf32>
    %161 = math.exp %160 : vector<4x128xf32>
    %cst_70 = arith.constant 1.000000e+00 : f32
    %162 = vector.broadcast %cst_70 : f32 to vector<4x128xf32>
    %163 = arith.addf %162, %161 : vector<4x128xf32>
    %164 = arith.divf %162, %163 : vector<4x128xf32>
    %165 = arith.mulf %156, %140 : vector<4x128xf32>
    %166 = arith.mulf %150, %158 : vector<4x128xf32>
    %167 = arith.addf %165, %166 : vector<4x128xf32>
    %168 = math.tanh %167 : vector<4x128xf32>
    %169 = arith.mulf %164, %168 : vector<4x128xf32>
    %170 = vector.extract_strided_slice %169 {offsets = [0, 0], sizes = [4, 64], strides = [1, 1]} : vector<4x128xf32> to vector<4x64xf32>
    %171 = arith.addf %130, %170 : vector<4x64xf32>
    %cst_71 = arith.constant dense<0.000000e+00> : vector<4x3xf32>
    %172 = tpu.matmul %171, %129, %cst_71 {dimension_numbers = #tpu.dot_dimension_numbers<[1], [1], [0], [0], [0, 0, 1, 0], [], []>} : vector<4x64xf32>, vector<3x64xf32>, vector<4x3xf32> -> vector<4x3xf32>
    %cst_72 = arith.constant dense<0xFF800000> : vector<4xf32>
    %173 = vector.multi_reduction <maximumf>, %172, %cst_72 [1] : vector<4x3xf32> to vector<4xf32>
    %174 = vector.shape_cast %173 : vector<4xf32> to vector<4x1xf32>
    %175 = vector.broadcast %174 : vector<4x1xf32> to vector<4x3xf32>
    %176 = arith.subf %172, %175 : vector<4x3xf32>
    %177 = math.exp %176 : vector<4x3xf32>
    %cst_73 = arith.constant dense<0.000000e+00> : vector<4xf32>
    %178 = vector.multi_reduction <add>, %177, %cst_73 [1] : vector<4x3xf32> to vector<4xf32>
    %179 = vector.shape_cast %178 : vector<4xf32> to vector<4x1xf32>
    %180 = tpu.reciprocal %179 {approx = true} : vector<4x1xf32> -> vector<4x1xf32>
    %181 = vector.broadcast %180 : vector<4x1xf32> to vector<4x3xf32>
    %182 = arith.mulf %177, %181 : vector<4x3xf32>
    %cst_74 = arith.constant dense<0.000000e+00> : vector<4x64xf32>
    %183 = tpu.matmul %182, %129, %cst_74 {dimension_numbers = #tpu.dot_dimension_numbers<[1], [0], [0], [1], [0, 0, 1, 1], [], []>} : vector<4x3xf32>, vector<3x64xf32>, vector<4x64xf32> -> vector<4x64xf32>
    %c1_i32_75 = arith.constant 1 : i32
    %cst_76 = arith.constant dense<0.000000e+00> : vector<4x512xf32>
    %184 = tpu.matmul %171, %132, %cst_76 {dimension_numbers = #tpu.dot_dimension_numbers<[1], [0], [0], [1], [0, 0, 1, 1], [], []>} : vector<4x64xf32>, vector<64x512xf32>, vector<4x512xf32> -> vector<4x512xf32>
    %185 = arith.addf %137, %184 : vector<4x512xf32>
    %cst_77 = arith.constant dense<0.000000e+00> : vector<4x512xf32>
    %186 = tpu.matmul %183, %133, %cst_77 {dimension_numbers = #tpu.dot_dimension_numbers<[1], [0], [0], [1], [0, 0, 1, 1], [], []>} : vector<4x64xf32>, vector<64x512xf32>, vector<4x512xf32> -> vector<4x512xf32>
    %187 = arith.addf %185, %186 : vector<4x512xf32>
    %188 = vector.extract_strided_slice %187 {offsets = [0, 0], sizes = [4, 128], strides = [1, 1]} : vector<4x512xf32> to vector<4x128xf32>
    %189 = arith.negf %188 : vector<4x128xf32>
    %190 = math.exp %189 : vector<4x128xf32>
    %cst_78 = arith.constant 1.000000e+00 : f32
    %191 = vector.broadcast %cst_78 : f32 to vector<4x128xf32>
    %192 = arith.addf %191, %190 : vector<4x128xf32>
    %193 = arith.divf %191, %192 : vector<4x128xf32>
    %194 = vector.extract_strided_slice %187 {offsets = [0, 128], sizes = [4, 128], strides = [1, 1]} : vector<4x512xf32> to vector<4x128xf32>
    %195 = arith.negf %194 : vector<4x128xf32>
    %196 = math.exp %195 : vector<4x128xf32>
    %cst_79 = arith.constant 1.000000e+00 : f32
    %197 = vector.broadcast %cst_79 : f32 to vector<4x128xf32>
    %198 = arith.addf %197, %196 : vector<4x128xf32>
    %199 = arith.divf %197, %198 : vector<4x128xf32>
    %200 = vector.extract_strided_slice %187 {offsets = [0, 256], sizes = [4, 128], strides = [1, 1]} : vector<4x512xf32> to vector<4x128xf32>
    %201 = math.tanh %200 : vector<4x128xf32>
    %202 = vector.extract_strided_slice %187 {offsets = [0, 384], sizes = [4, 128], strides = [1, 1]} : vector<4x512xf32> to vector<4x128xf32>
    %203 = arith.negf %202 : vector<4x128xf32>
    %204 = math.exp %203 : vector<4x128xf32>
    %cst_80 = arith.constant 1.000000e+00 : f32
    %205 = vector.broadcast %cst_80 : f32 to vector<4x128xf32>
    %206 = arith.addf %205, %204 : vector<4x128xf32>
    %207 = arith.divf %205, %206 : vector<4x128xf32>
    %208 = arith.mulf %199, %167 : vector<4x128xf32>
    %209 = arith.mulf %193, %201 : vector<4x128xf32>
    %210 = arith.addf %208, %209 : vector<4x128xf32>
    %211 = math.tanh %210 : vector<4x128xf32>
    %212 = arith.mulf %207, %211 : vector<4x128xf32>
    %213 = vector.extract_strided_slice %212 {offsets = [0, 0], sizes = [4, 64], strides = [1, 1]} : vector<4x128xf32> to vector<4x64xf32>
    %214 = arith.addf %130, %213 : vector<4x64xf32>
    %cst_81 = arith.constant dense<0.000000e+00> : vector<4x3xf32>
    %215 = tpu.matmul %214, %129, %cst_81 {dimension_numbers = #tpu.dot_dimension_numbers<[1], [1], [0], [0], [0, 0, 1, 0], [], []>} : vector<4x64xf32>, vector<3x64xf32>, vector<4x3xf32> -> vector<4x3xf32>
    %cst_82 = arith.constant dense<0xFF800000> : vector<4xf32>
    %216 = vector.multi_reduction <maximumf>, %215, %cst_82 [1] : vector<4x3xf32> to vector<4xf32>
    %217 = vector.shape_cast %216 : vector<4xf32> to vector<4x1xf32>
    %218 = vector.broadcast %217 : vector<4x1xf32> to vector<4x3xf32>
    %219 = arith.subf %215, %218 : vector<4x3xf32>
    %220 = math.exp %219 : vector<4x3xf32>
    %cst_83 = arith.constant dense<0.000000e+00> : vector<4xf32>
    %221 = vector.multi_reduction <add>, %220, %cst_83 [1] : vector<4x3xf32> to vector<4xf32>
    %222 = vector.shape_cast %221 : vector<4xf32> to vector<4x1xf32>
    %223 = tpu.reciprocal %222 {approx = true} : vector<4x1xf32> -> vector<4x1xf32>
    %224 = vector.broadcast %223 : vector<4x1xf32> to vector<4x3xf32>
    %225 = arith.mulf %220, %224 : vector<4x3xf32>
    %cst_84 = arith.constant dense<0.000000e+00> : vector<4x64xf32>
    %226 = tpu.matmul %225, %129, %cst_84 {dimension_numbers = #tpu.dot_dimension_numbers<[1], [0], [0], [1], [0, 0, 1, 1], [], []>} : vector<4x3xf32>, vector<3x64xf32>, vector<4x64xf32> -> vector<4x64xf32>
    %c0_85 = arith.constant 0 : index
    %c0_86 = arith.constant 0 : index
    %c64_87 = arith.constant 64 : index
    %227 = vector.load %arg5[%c0_85, %c0_86, %c64_87] : memref<1x4x128xf32, #tpu.memory_space<vmem>>, vector<1x4x64xf32>
    %228 = vector.shape_cast %227 : vector<1x4x64xf32> to vector<4x64xf32>
    %229 = vector.shape_cast %214 : vector<4x64xf32> to vector<1x4x64xf32>
    tpu.vector_store %arg5[%c0_85, %c0_86, %c64_87], %229 {strides = array<i32>} : memref<1x4x128xf32, #tpu.memory_space<vmem>>, vector<1x4x64xf32>,
    return
  }
  func.func @transform_0(%arg0: i32) -> (i32, i32, i32) {
    %c0_i32 = arith.constant 0 : i32
    %c0_i32_0 = arith.constant 0 : i32
    %c0_i32_1 = arith.constant 0 : i32
    return %arg0, %c0_i32, %c0_i32_0 : i32, i32, i32
  }
  func.func @transform_1(%arg0: i32) -> (i32, i32, i32) {
    %c0_i32 = arith.constant 0 : i32
    %c0_i32_0 = arith.constant 0 : i32
    %c0_i32_1 = arith.constant 0 : i32
    return %arg0, %c0_i32, %c0_i32_0 : i32, i32, i32
  }
  func.func @transform_2(%arg0: i32) -> (i32, i32) {
    %c0_i32 = arith.constant 0 : i32
    %c0_i32_0 = arith.constant 0 : i32
    %c0_i32_1 = arith.constant 0 : i32
    return %c0_i32, %c0_i32_0 : i32, i32
  }
  func.func @transform_3(%arg0: i32) -> (i32, i32) {
    %c0_i32 = arith.constant 0 : i32
    %c0_i32_0 = arith.constant 0 : i32
    %c0_i32_1 = arith.constant 0 : i32
    return %c0_i32, %c0_i32_0 : i32, i32
  }
  func.func @transform_4(%arg0: i32) -> (i32, i32, i32) {
    %c0_i32 = arith.constant 0 : i32
    %c0_i32_0 = arith.constant 0 : i32
    %c0_i32_1 = arith.constant 0 : i32
    return %arg0, %c0_i32, %c0_i32_0 : i32, i32, i32
  }
  func.func @transform_5(%arg0: i32) -> (i32, i32, i32) {
    %c0_i32 = arith.constant 0 : i32
    %c0_i32_0 = arith.constant 0 : i32
    %c0_i32_1 = arith.constant 0 : i32
    return %arg0, %c0_i32, %c0_i32_0 : i32, i32, i32
  }
}

</mosaic_0001>

<bundles_post_ra>
// kernel: tpu_custom_call.1
= control target key start
LH: loop header
LB: loop body
LE: loop exit
PB: predicated region body
PF: predicated region fallthrough
CT: control target
= control target key end

     0   :  { %11 = vsyncpa [#allocation4], 0  ;;  %s5411_s0 = inlined_call_operand.vmem [shape: s32[8,120,2], index: 0, kind: input, shape index: {}]   ;;  %s5412_s1 = inlined_call_operand.vmem [shape: f32[8,3,64], index: 1, kind: input, shape index: {}]   ;;  %s5413_s2 = inlined_call_operand.hbm [shape: f32[304,128], index: 2, kind: input, shape index: {}]   ;;  %s5414_s3 = inlined_call_operand.vmem [shape: f32[200,512], index: 3, kind: input, shape index: {}]   ;;  %s5415_s4 = inlined_call_operand.hbm [shape: f32[8,4,128], index: 4, kind: output, shape index: {0}]   ;;  %s5416_s5 = inlined_call_operand.vmem [shape: f32[8,7,64], index: 5, kind: output, shape index: {1}]  }
   0x1   :  { %12 = vsyncpa [#allocation5], 0 }
   0x2   :  { %14 = vsyncpa [#allocation5 + $0x1], 0  ;;  %s4351_s18 = smov 0   ;;  %s4353_s19 = smov 0  }
   0x3   :  { %s4355_s20 = smov 0   ;;  %s4357_s21 = smov 0  }
   0x4 LB: > { %s4372_s22 = sadd.s32 4294967295, %s4308_s21   ;;  %s3040_s23 = sadd.s32 4294967294, %s4308_s21   ;;  %s4308_s21 = sphi %s4357_s21, %s5434_s21   ;;  %s4304_s20 = sphi %s4355_s20, %s5433_s20   ;;  %s4300_s19 = sphi %s4353_s19, %s5432_s19   ;;  %s4296_s18 = sphi %s4351_s18, %s5431_s18  }
   0x5   : > { %s4376_s24 = sadd.s32 1, %s4308_s21   ;;  %s121_s25 = sadd.s32 1, %s4304_s20 }
   0x6   : > { %s118_s26 = ssub.s32 %s4308_s21, %s4376_s24  ;;  %p131_p0 = scmp.ne.s32.totalorder %s4304_s20, %s4300_s19 }
   0x7   : > { %p119_p1 = scmp.eq.s32.totalorder %s118_s26, 0  ;;  %p132_p2 = scmp.eq.s32.totalorder %s4372_s22, 7 }
   0x8   : > { %p137_p3 = scmp.ne.s32.totalorder %s4300_s19, %s4296_s18  ;;  %p138_p4 = scmp.eq.s32.totalorder %s3040_s23, 7 }
   0x9   : > { %s4387_s27 = scalar_select %p119_p1, %s4304_s20, %s121_s25  }
   0xa   : > { %p4389_p5 = por %p132_p2, %p131_p0  ;;  %p4393_p6 = por %p138_p4, %p137_p3 }
   0xb   : > { %p3041_p7 = scmp.ge.s32.totalorder %s4308_s21, 1  ;;  %p171_p8 = scmp.lt.s32.totalorder %s4308_s21, 9 }
   0xc   : > { %s5420_s28 = scalar_select %p4389_p5, 1, 0 }
   0xd   : > { %s5421_s29 = scalar_select %p4393_p6, 1, 0 }
   0xe   : > { %p5417_p9 = scmp.eq.s32.totalorder %s4372_s22, 0  ;;  %p4400_p10 = pnand %p3041_p7, %p171_p8 }
   0xf   : > { %s4310_s6 = smov [#allocation3]   ;;  %s4214_s11 = scalar_lea.hbm %s5413_s2, 4864 }
  0x10   : > { %s5422_s30 = scalar_select %p4400_p10, 1, 0 }
  0x11   : > { %s183_s7 = sshll.u32 %s4310_s6, 4  ;;  %p4053_p11 = pneg %p4400_p10  ;;  %s184_s7 = int_to_ptr.vmem [resolvable:$true] %s183_s7 }
  0x12   : > { %p4215_p13 = scmp.ne.s32.totalorder %s5413_s2, %s4214_s11  ;;  %p4221_p3 = scmp.lt.u32.totalorder %s4214_s11, %s5413_s2 }
  0x13   : > { %p4408_p12 = pnand %p5417_p9, %p4053_p11 }
  0x15   : > { %p4216_p0 = pneg %p4408_p12 }
  0x17   : > { %p4217_p1 = pnand %p4216_p0, %p4215_p13 }
  0x19   : > { %p4218_p2 = pneg %p4217_p1 }
  0x1b   : > { %p4223_p4 = pnand %p4221_p3, %p4218_p2 }
  0x1d   : > { %4226 = shalt.err (!%p4223_p4)
}
  0x1e   : > { %s4227_s16 = scalar_lea.vmem %s184_s7, 4864  ;;  %p4235_p9 = scmp.lt.s32.totalorder %s184_s7, %s184_s7 }
  0x1f   : > { %p4228_p7 = scmp.ne.s32.totalorder %s184_s7, %s4227_s16  ;;  %p4236_p6 = scmp.lt.s32.totalorder %s4227_s16, %s4227_s16 }
  0x21   : > { %p4230_p8 = pnand %p4228_p7, %p4216_p0  ;;  %p4237_p5 = por %p4236_p6, %p4235_p9 }
  0x23   : > { %p4231_p11 = pneg %p4230_p8 }
  0x25   : > { %p4238_p10 = pnand %p4237_p5, %p4231_p11 }
  0x27   : > { %4241 = shalt.err (!%p4238_p10)
}
  0x28   : > { %s4311_s17 = smov 128   ;;  %s4312_s23 = smov 8  }
  0x29   : > { %4056 = dma.hbm_to_vmem [thread:$0]  (!%p4408_p12), %s5413_s2, 4864, %s184_s7, [#allocation4], %s4311_s17, %s4311_s17, %s4312_s23  }
  0x2a   : > { %p5424_p13 = scmp.ne.s32.totalorder %s5422_s30, 0 }
  0x2b   : > { %p5425_p1 = scmp.eq.s32.totalorder (!%p5424_p13), %s4372_s22, 0 }
  0x2c   : > { %217 = sbr.rel (%p5424_p13) target bundleno = 3610 (0xe1a), region = 36 }
  0x33   : > { %4287 = dma.done.wait (%p5425_p1), [#allocation4], 4864   ;;  %p5426_p0 = pmov %p5425_p1 }
  0x34   : > { %p253_p5 = scmp.lt.s32.totalorder %s4372_s22, 7  ;;  %v4313_v0 = vmov 0   ;;  %v4314_v1 = vmov 0.0|0.0   ;;  %vm4315_vm0 = vmmov 0   ;;  %v4316_v4 = vmov 0.0   ;;  %v4454_v6 = vld [vmem:[#allocation3 + $0x18] sm:$0xff] }
  0x35   : > { %4289 = vsyncadd (%p5426_p0), [#allocation4], 4294962432  ;;  %4108 = vset.pattern.permute.xlu1 %v4313_v0  ;;  %4106 = vset.pattern.permute.xlu0 %v4313_v0  ;;  %v4317_v5 = vmov 1   ;;  %v4456_v7 = vld [vmem:[#allocation3 + $0x20] sm:$0xff]  ;;  %v4460_v9 = vld [vmem:[#allocation3 + $0x38] sm:$0xff]  ;;  %vm512_vm1 = vcmask 1044480   ;;  %v281_v40 = vlaneseq }
  0x36   : > { %s4438_s6 = scalar_select %p253_p5, %s4372_s22, 7  ;;  %3734 = vmatprep.subr.bf16.mxu0 %v4314_v1  ;;  %3737 = vmatprep.subr.bf16.mxu1 %v4314_v1  ;;  %v3753_v8 = vpack.c.bf16 %v4456_v7, %v4454_v6  ;;  %v4462_v10 = vld [vmem:[#allocation3 + $0x40] sm:$0xff]  ;;  %v464_v14 = vld [vmem:[#allocation3 + $0x8] sm:$0xff]  ;;  %v465_v17 = vld [vmem:[#allocation3 + $0x10] sm:$0x1f]  ;;  %v4111_v29 = vpack.i.bf16 %v4456_v7, %v4454_v6  ;;  %vm466_vm2 = vcmask 171008  }
  0x37   : > { %3353 = vmatprep.mubr.msk.f32.mxu0 %vm4315_vm0, %v4316_v4  ;;  %3404 = vmatprep.mubr.msk.f32.mxu1 %vm4315_vm0, %v4316_v4  ;;  %v463_v11 = vld [vmem:[#allocation3] sm:$0xff]  ;;  %v3759_v13 = vpack.c.bf16 %v4462_v10, %v4460_v9  ;;  %v843_v30 = vld [vmem:[#allocation3 + $0x28] sm:$0xff]  ;;  %v844_v31 = vld [vmem:[#allocation3 + $0x30] sm:$0xff]  ;;  %s4318_s10 = smov 64   ;;  %v4121_v34 = vpack.i.bf16 %v4462_v10, %v4460_v9  ;;  %v4502_v41 = vand.u32 127, %v281_v40  ;;  %s244_s15 = sand.u32 1, %s4300_s19  }
  0x38   : > { %s4046_s30 = smul.u32 120, %s4438_s6  ;;  %v3735_v15 = vpack.c.bf16 %v464_v14, %v463_v11  ;;  %v4116_v32 = vpack.i.bf16 %v844_v31, %v843_v30  ;;  %v3756_v33 = vpack.c.bf16 %v844_v31, %v843_v30  ;;  %v851_v35 = vld [vmem:[#allocation3 + $0x5b] sm:$0x3]  ;;  %v4492_v36 = vld [vmem:[#allocation3 + $0x48] sm:$0xff]  ;;  %v4494_v37 = vld [vmem:[#allocation3 + $0x50] sm:$0xff]  ;;  %s3048_s11 = sshll.u32 %s4438_s6, 2 }
  0x39   : > { %v4126_v38 = vpack.i.bf16 %v4494_v37, %v4492_v36  ;;  %v3762_v39 = vpack.c.bf16 %v4494_v37, %v4492_v36  ;;  %s261_s14 = scalar_lea.vmem %s5412_s1, %s3048_s11  ;;  %s3046_s16 = sshll.u32 %s244_s15, 2 }
  0x3a   : > { %s4446_s9 = scalar_lea.vmem %s5411_s0, %s4046_s30  ;;  %3736 = vmatpush3.bf16.msra.mxu0 %v3735_v15  ;;  %3739 = vmatpush3.bf16.msra.mxu1 %v3735_v15  ;;  %s4319_s17 = smov 32  }
  0x3b   : > { %v267_v2 = vld [vmem:[%s4446_s9 + $0x8] sm:$0xff]  ;;  %v266_v3 = vld [vmem:[%s4446_s9] sm:$0xff]  ;;  %v268_v12 = vld [vmem:[%s4446_s9 + $0x10] sm:$0xff]  ;;  %3351 = vmatprep.subr.mxu0 %v4316_v4  ;;  %3402 = vmatprep.subr.mxu1 %v4316_v4  ;;  %s4886_s23 = scalar_lea.vmem [#allocation6], %s3046_s16  ;;  %s3049_s8 = sshll.u32 %s4438_s6, 3 }
  0x3c   : > { %287 = vperm.xlu1 %4108, %v267_v2   ;;  %284 = vperm.xlu0 %4106, %v266_v3   ;;  %v269_v16 = vld [vmem:[%s4446_s9 + $0x18] sm:$0xff]  ;;  %v270_v18 = vld [vmem:[%s4446_s9 + $0x20] sm:$0xff]  ;;  %v271_v19 = vld [vmem:[%s4446_s9 + $0x28] sm:$0xff]  ;;  %s2930_s25 = sshll.u32 %s4886_s23, 4  ;;  %s2913_s7 = scalar_lea.sflag [#allocation5], %s244_s15  ;;  %s5368_s25 = int_to_ptr.vmem [resolvable:$true] %s2930_s25 }
  0x3d   : > { %v272_v20 = vld [vmem:[%s4446_s9 + $0x30] sm:$0xff]  ;;  %v273_v21 = vld [vmem:[%s4446_s9 + $0x38] sm:$0xff]  ;;  %v274_v22 = vld [vmem:[%s4446_s9 + $0x40] sm:$0xff]  ;;  %p5429_p9 = scmp.ne.s32.totalorder %s5420_s28, 0 }
  0x3e   : > { %3352 = vmatpush3.msk.msra.mxu0 %vm512_vm1, %v465_v17  ;;  %3403 = vmatpush3.msk.msra.mxu1 %vm512_vm1, %v465_v17  ;;  %v275_v23 = vld [vmem:[%s4446_s9 + $0x48] sm:$0xff]  ;;  %v276_v24 = vld [vmem:[%s4446_s9 + $0x50] sm:$0xff]  ;;  %v277_v25 = vld [vmem:[%s4446_s9 + $0x58] sm:$0xff] }
  0x3f   : > { %3740 = vmatprep.subr.bf16.mxu0 %v4314_v1  ;;  %3752 = vmatprep.subr.bf16.mxu1 %v4314_v1  ;;  %v278_v26 = vld [vmem:[%s4446_s9 + $0x60] sm:$0xff]  ;;  %v279_v27 = vld [vmem:[%s4446_s9 + $0x68] sm:$0xff]  ;;  %v280_v28 = vld [vmem:[%s4446_s9 + $0x70] sm:$0xff] }
  0x40   : > { %4109 = vset.pattern.permute.xlu1 %v4317_v5  ;;  %4107 = vset.pattern.permute.xlu0 %v4317_v5 }
  0x41   : > { %377 = vperm.xlu1 %4109, %v267_v2   ;;  %374 = vperm.xlu0 %4107, %v266_v3  }
  0x45   : > { %4110 = vset.pattern.permute.xlu1 %v4313_v0  ;;  %380 = vperm.xlu0 %4107, %v268_v12  }
  0x46   : > { %290 = vperm.xlu1 %4110, %v268_v12  }
  0x49   : > { %383 = vperm.xlu0 %4107, %v269_v16  }
  0x4a   : > { %293 = vperm.xlu1 %4110, %v269_v16  }
  0x4d   : > { %386 = vperm.xlu0 %4107, %v270_v18  }
  0x4e   : > { %296 = vperm.xlu1 %4110, %v270_v18  }
  0x51   : > { %389 = vperm.xlu0 %4107, %v271_v19  }
  0x52   : > { %299 = vperm.xlu1 %4110, %v271_v19  }
  0x55   : > { %392 = vperm.xlu0 %4107, %v272_v20  }
  0x56   : > { %302 = vperm.xlu1 %4110, %v272_v20  }
  0x59   : > { %395 = vperm.xlu0 %4107, %v273_v21  }
  0x5a   : > { %305 = vperm.xlu1 %4110, %v273_v21  }
  0x5d   : > { %398 = vperm.xlu0 %4107, %v274_v22  }
  0x5e   : > { %308 = vperm.xlu1 %4110, %v274_v22  }
  0x61   : > { %401 = vperm.xlu0 %4107, %v275_v23  }
  0x62   : > { %311 = vperm.xlu1 %4110, %v275_v23  }
  0x65   : > { %404 = vperm.xlu0 %4107, %v276_v24  }
  0x66   : > { %314 = vperm.xlu1 %4110, %v276_v24  }
  0x69   : > { %407 = vperm.xlu0 %4107, %v277_v25  }
  0x6a   : > { %317 = vperm.xlu1 %4110, %v277_v25  }
  0x6d   : > { %410 = vperm.xlu0 %4107, %v278_v26  }
  0x6e   : > { %320 = vperm.xlu1 %4110, %v278_v26  }
  0x71   : > { %413 = vperm.xlu0 %4107, %v279_v27  }
  0x72   : > { %323 = vperm.xlu1 %4110, %v279_v27  }
  0x75   : > { %416 = vperm.xlu0 %4107, %v280_v28  }
  0x76   : > { %326 = vperm.xlu1 %4110, %v280_v28  }
  0x79   : > { %4131 = vset.pattern.permute.xlu0 %v4313_v0 }
  0x7a   : > { %4112 = vrot.lane.b32.xlu1 %v4111_v29, %s4318_s10  ;;  %4117 = vrot.lane.b32.xlu0 %v4116_v32, %s4318_s10 }
  0x7e   : > { %4122 = vrot.lane.b32.xlu1 %v4121_v34, %s4318_s10  ;;  %4127 = vrot.lane.b32.xlu0 %v4126_v38, %s4318_s10 }
  0x82   : > { %1291 = vperm.xlu1 %4110, %v851_v35  }
  0xbb   : > { %v285_v42 = vpop.permute.xlu0 %284  ;;  %v288_v43 = vpop.permute.xlu1 %287 }
  0xbc   : > { %vm328_vm3 = vcmp.eq.s32.totalorder %v285_v42, %v4502_v41  ;;  %vm329_vm4 = vcmp.eq.s32.totalorder %v288_v43, %v4502_v41 }
  0xbd   : > { %v3050_v44 = vsel %vm328_vm3, 1.0, %v4316_v4  ;;  %v3051_v45 = vsel %vm329_vm4, 1.0, %v4316_v4 }
  0xbe   : > { %3354 = vmatmul.mubr.msk.f32.vlgmr.msra.gmra.mrb[0].mxu0 %vm466_vm2, %v3050_v44 }
  0xbf   : > { %3356 = vmatprep.mubr.msk.f32.mxu0 %vm4315_vm0, %v4316_v4 }
  0xc0   : > { %v375_v46 = vpop.permute.xlu0 %374  ;;  %v378_v47 = vpop.permute.xlu1 %377 }
  0xc1   : > { %vm418_vm5 = vcmp.eq.s32.totalorder %v375_v46, %v4502_v41  ;;  %vm419_vm6 = vcmp.eq.s32.totalorder %v378_v47, %v4502_v41 }
  0xc2   : > { %v3065_v48 = vsel %vm418_vm5, 1.0, %v4316_v4  ;;  %3357 = vmatmul.mubr.msk.f32.gmra.mrb[2].mxu0 %vm466_vm2, %v3051_v45  ;;  %v3066_v49 = vsel %vm419_vm6, 1.0, %v4316_v4 }
  0xc3   : > { %3405 = vmatmul.mubr.msk.f32.vlgmr.msra.gmra.mrb[0].mxu1 %vm466_vm2, %v3065_v48  ;;  %3359 = vmatprep.mubr.msk.f32.mxu0 %vm4315_vm0, %v4316_v4 }
  0xc4   : > { %v381_v50 = vpop.permute.xlu0 %380  ;;  %3407 = vmatprep.mubr.msk.f32.mxu1 %vm4315_vm0, %v4316_v4  ;;  %3754 = vmatpush3.bf16.msra.mxu1 %v3753_v8 }
  0xc5   : > { %v291_v51 = vpop.permute.xlu1 %290  ;;  %3755 = vmatprep.subr.bf16.mxu1 %v4314_v1  ;;  %vm420_vm8 = vcmp.eq.s32.totalorder %v381_v50, %v4502_v41 }
  0xc6   : > { %vm330_vm7 = vcmp.eq.s32.totalorder %v291_v51, %v4502_v41  ;;  %v3067_v55 = vsel %vm420_vm8, 1.0, %v4316_v4 }
  0xc7   : > { %v3052_v52 = vsel %vm330_vm7, 1.0, %v4316_v4  ;;  %3408 = vmatmul.mubr.msk.f32.gmra.mrb[2].mxu1 %vm466_vm2, %v3066_v49 }
  0xc8   : > { %3360 = vmatmul.mubr.msk.f32.gmra.mrb[4].mxu0 %vm466_vm2, %v3052_v52  ;;  %v384_v53 = vpop.permute.xlu0 %383  ;;  %3410 = vmatprep.mubr.msk.f32.mxu1 %vm4315_vm0, %v4316_v4 }
  0xc9   : > { %v294_v54 = vpop.permute.xlu1 %293  ;;  %3362 = vmatprep.mubr.msk.f32.mxu0 %vm4315_vm0, %v4316_v4  ;;  %3757 = vmatpush3.bf16.msra.mxu1 %v3756_v33  ;;  %vm421_vm10 = vcmp.eq.s32.totalorder %v384_v53, %v4502_v41 }
  0xca   : > { %vm331_vm9 = vcmp.eq.s32.totalorder %v294_v54, %v4502_v41  ;;  %3758 = vmatprep.subr.bf16.mxu1 %v4314_v1  ;;  %v3068_v59 = vsel %vm421_vm10, 1.0, %v4316_v4 }
  0xcb   : > { %v3053_v56 = vsel %vm331_vm9, 1.0, %v4316_v4  ;;  %3411 = vmatmul.mubr.msk.f32.gmra.mrb[4].mxu1 %vm466_vm2, %v3067_v55 }
  0xcc   : > { %3363 = vmatmul.mubr.msk.f32.gmra.mrb[6].mxu0 %vm466_vm2, %v3053_v56  ;;  %v387_v57 = vpop.permute.xlu0 %386  ;;  %3413 = vmatprep.mubr.msk.f32.mxu1 %vm4315_vm0, %v4316_v4 }
  0xcd   : > { %v297_v58 = vpop.permute.xlu1 %296  ;;  %3365 = vmatprep.mubr.msk.f32.mxu0 %vm4315_vm0, %v4316_v4  ;;  %3760 = vmatpush3.bf16.msra.mxu1 %v3759_v13  ;;  %vm422_vm12 = vcmp.eq.s32.totalorder %v387_v57, %v4502_v41 }
  0xce   : > { %vm332_vm11 = vcmp.eq.s32.totalorder %v297_v58, %v4502_v41  ;;  %3761 = vmatprep.subr.bf16.mxu1 %v4314_v1  ;;  %v3069_v63 = vsel %vm422_vm12, 1.0, %v4316_v4 }
  0xcf   : > { %v3054_v60 = vsel %vm332_vm11, 1.0, %v4316_v4  ;;  %3414 = vmatmul.mubr.msk.f32.gmra.mrb[6].mxu1 %vm466_vm2, %v3068_v59 }
  0xd0   : > { %3366 = vmatmul.mubr.msk.f32.gmra.mrb[8].mxu0 %vm466_vm2, %v3054_v60  ;;  %v390_v61 = vpop.permute.xlu0 %389  ;;  %3416 = vmatprep.mubr.msk.f32.mxu1 %vm4315_vm0, %v4316_v4 }
  0xd1   : > { %v300_v62 = vpop.permute.xlu1 %299  ;;  %3368 = vmatprep.mubr.msk.f32.mxu0 %vm4315_vm0, %v4316_v4  ;;  %3763 = vmatpush3.bf16.msra.mxu1 %v3762_v39  ;;  %vm423_vm14 = vcmp.eq.s32.totalorder %v390_v61, %v4502_v41 }
  0xd2   : > { %vm333_vm13 = vcmp.eq.s32.totalorder %v300_v62, %v4502_v41  ;;  %3792 = vmatprep.subr.bf16.mxu1 %v4314_v1  ;;  %v3070_v5 = vsel %vm423_vm14, 1.0, %v4316_v4 }
  0xd3   : > { %v3055_v0 = vsel %vm333_vm13, 1.0, %v4316_v4  ;;  %3417 = vmatmul.mubr.msk.f32.gmra.mrb[8].mxu1 %vm466_vm2, %v3069_v63 }
  0xd4   : > { %3369 = vmatmul.mubr.msk.f32.gmra.mrb[10].mxu0 %vm466_vm2, %v3055_v0  ;;  %v393_v2 = vpop.permute.xlu0 %392  ;;  %3419 = vmatprep.mubr.msk.f32.mxu1 %vm4315_vm0, %v4316_v4 }
  0xd5   : > { %v303_v3 = vpop.permute.xlu1 %302  ;;  %3371 = vmatprep.mubr.msk.f32.mxu0 %vm4315_vm0, %v4316_v4  ;;  %vm424_vm1 = vcmp.eq.s32.totalorder %v393_v2, %v4502_v41 }
  0xd6   : > { %vm334_vm15 = vcmp.eq.s32.totalorder %v303_v3, %v4502_v41  ;;  %v3071_v9 = vsel %vm424_vm1, 1.0, %v4316_v4 }
  0xd7   : > { %v3056_v6 = vsel %vm334_vm15, 1.0, %v4316_v4  ;;  %3420 = vmatmul.mubr.msk.f32.gmra.mrb[10].mxu1 %vm466_vm2, %v3070_v5 }
  0xd8   : > { %3372 = vmatmul.mubr.msk.f32.gmra.mrb[12].mxu0 %vm466_vm2, %v3056_v6  ;;  %v396_v7 = vpop.permute.xlu0 %395  ;;  %3422 = vmatprep.mubr.msk.f32.mxu1 %vm4315_vm0, %v4316_v4 }
  0xd9   : > { %v306_v8 = vpop.permute.xlu1 %305  ;;  %3374 = vmatprep.mubr.msk.f32.mxu0 %vm4315_vm0, %v4316_v4  ;;  %vm425_vm4 = vcmp.eq.s32.totalorder %v396_v7, %v4502_v41 }
  0xda   : > { %vm335_vm3 = vcmp.eq.s32.totalorder %v306_v8, %v4502_v41  ;;  %v3072_v13 = vsel %vm425_vm4, 1.0, %v4316_v4 }
  0xdb   : > { %v3057_v10 = vsel %vm335_vm3, 1.0, %v4316_v4  ;;  %3423 = vmatmul.mubr.msk.f32.gmra.mrb[12].mxu1 %vm466_vm2, %v3071_v9 }
  0xdc   : > { %3375 = vmatmul.mubr.msk.f32.gmra.mrb[14].mxu0 %vm466_vm2, %v3057_v10  ;;  %v399_v11 = vpop.permute.xlu0 %398  ;;  %3425 = vmatprep.mubr.msk.f32.mxu1 %vm4315_vm0, %v4316_v4 }
  0xdd   : > { %v309_v12 = vpop.permute.xlu1 %308  ;;  %3377 = vmatprep.mubr.msk.f32.mxu0 %vm4315_vm0, %v4316_v4  ;;  %vm426_vm6 = vcmp.eq.s32.totalorder %v399_v11, %v4502_v41 }
  0xde   : > { %vm336_vm5 = vcmp.eq.s32.totalorder %v309_v12, %v4502_v41  ;;  %v3073_v17 = vsel %vm426_vm6, 1.0, %v4316_v4 }
  0xdf   : > { %v3058_v14 = vsel %vm336_vm5, 1.0, %v4316_v4  ;;  %3426 = vmatmul.mubr.msk.f32.gmra.mrb[14].mxu1 %vm466_vm2, %v3072_v13 }
  0xe0   : > { %3378 = vmatmul.mubr.msk.f32.gmra.mrb[16].mxu0 %vm466_vm2, %v3058_v14  ;;  %v402_v15 = vpop.permute.xlu0 %401  ;;  %3428 = vmatprep.mubr.msk.f32.mxu1 %vm4315_vm0, %v4316_v4 }
  0xe1   : > { %v312_v16 = vpop.permute.xlu1 %311  ;;  %3380 = vmatprep.mubr.msk.f32.mxu0 %vm4315_vm0, %v4316_v4  ;;  %vm427_vm8 = vcmp.eq.s32.totalorder %v402_v15, %v4502_v41 }
  0xe2   : > { %vm337_vm7 = vcmp.eq.s32.totalorder %v312_v16, %v4502_v41  ;;  %v3074_v21 = vsel %vm427_vm8, 1.0, %v4316_v4 }
  0xe3   : > { %v3059_v18 = vsel %vm337_vm7, 1.0, %v4316_v4  ;;  %3429 = vmatmul.mubr.msk.f32.gmra.mrb[16].mxu1 %vm466_vm2, %v3073_v17 }
  0xe4   : > { %3381 = vmatmul.mubr.msk.f32.gmra.mrb[18].mxu0 %vm466_vm2, %v3059_v18  ;;  %v405_v19 = vpop.permute.xlu0 %404  ;;  %3431 = vmatprep.mubr.msk.f32.mxu1 %vm4315_vm0, %v4316_v4 }
  0xe5   : > { %v315_v20 = vpop.permute.xlu1 %314  ;;  %3383 = vmatprep.mubr.msk.f32.mxu0 %vm4315_vm0, %v4316_v4  ;;  %vm428_vm10 = vcmp.eq.s32.totalorder %v405_v19, %v4502_v41 }
  0xe6   : > { %vm338_vm9 = vcmp.eq.s32.totalorder %v315_v20, %v4502_v41  ;;  %v3075_v25 = vsel %vm428_vm10, 1.0, %v4316_v4  ;;  %vm1432_vm10 = vcmask 982016  }
  0xe7   : > { %v3060_v22 = vsel %vm338_vm9, 1.0, %v4316_v4  ;;  %3432 = vmatmul.mubr.msk.f32.gmra.mrb[18].mxu1 %vm466_vm2, %v3074_v21  ;;  %vm1425_vm9 = vcmask 977920  }
  0xe8   : > { %3384 = vmatmul.mubr.msk.f32.gmra.mrb[20].mxu0 %vm466_vm2, %v3060_v22  ;;  %v408_v23 = vpop.permute.xlu0 %407  ;;  %3434 = vmatprep.mubr.msk.f32.mxu1 %vm4315_vm0, %v4316_v4 }
  0xe9   : > { %v318_v24 = vpop.permute.xlu1 %317  ;;  %3386 = vmatprep.mubr.msk.f32.mxu0 %vm4315_vm0, %v4316_v4  ;;  %vm429_vm12 = vcmp.eq.s32.totalorder %v408_v23, %v4502_v41 }
  0xea   : > { %vm339_vm11 = vcmp.eq.s32.totalorder %v318_v24, %v4502_v41  ;;  %v3076_v29 = vsel %vm429_vm12, 1.0, %v4316_v4  ;;  %vm1602_vm12 = vcmask 257024  }
  0xeb   : > { %v3061_v26 = vsel %vm339_vm11, 1.0, %v4316_v4  ;;  %3435 = vmatmul.mubr.msk.f32.gmra.mrb[20].mxu1 %vm466_vm2, %v3075_v25  ;;  %vm1611_vm11 = vcmask 518144  }
  0xec   : > { %3387 = vmatmul.mubr.msk.f32.gmra.mrb[22].mxu0 %vm466_vm2, %v3061_v26  ;;  %v411_v27 = vpop.permute.xlu0 %410  ;;  %3437 = vmatprep.mubr.msk.f32.mxu1 %vm4315_vm0, %v4316_v4 }
  0xed   : > { %v321_v28 = vpop.permute.xlu1 %320  ;;  %3389 = vmatprep.mubr.msk.f32.mxu0 %vm4315_vm0, %v4316_v4  ;;  %vm430_vm14 = vcmp.eq.s32.totalorder %v411_v27, %v4502_v41 }
  0xee   : > { %vm340_vm13 = vcmp.eq.s32.totalorder %v321_v28, %v4502_v41  ;;  %v3077_v33 = vsel %vm430_vm14, 1.0, %v4316_v4  ;;  %vm1797_vm14 = vcmask 522240  }
  0xef   : > { %v3062_v30 = vsel %vm340_vm13, 1.0, %v4316_v4  ;;  %3438 = vmatmul.mubr.msk.f32.gmra.mrb[22].mxu1 %vm466_vm2, %v3076_v29  ;;  %vm1608_vm13 = vcmask 519424  }
  0xf0   : > { %3390 = vmatmul.mubr.msk.f32.gmra.mrb[24].mxu0 %vm466_vm2, %v3062_v30  ;;  %v414_v31 = vpop.permute.xlu0 %413  ;;  %3440 = vmatprep.mubr.msk.f32.mxu1 %vm4315_vm0, %v4316_v4 }
  0xf1   : > { %v324_v32 = vpop.permute.xlu1 %323  ;;  %3392 = vmatprep.mubr.msk.f32.mxu0 %vm4315_vm0, %v4316_v4  ;;  %vm431_vm1 = vcmp.eq.s32.totalorder %v414_v31, %v4502_v41 }
  0xf2   : > { %vm341_vm15 = vcmp.eq.s32.totalorder %v324_v32, %v4502_v41  ;;  %v3078_v37 = vsel %vm431_vm1, 1.0, %v4316_v4 }
  0xf3   : > { %v3063_v34 = vsel %vm341_vm15, 1.0, %v4316_v4  ;;  %3441 = vmatmul.mubr.msk.f32.gmra.mrb[24].mxu1 %vm466_vm2, %v3077_v33 }
  0xf4   : > { %3393 = vmatmul.mubr.msk.f32.gmra.mrb[26].mxu0 %vm466_vm2, %v3063_v34  ;;  %v417_v35 = vpop.permute.xlu0 %416  ;;  %3443 = vmatprep.mubr.msk.f32.mxu1 %vm4315_vm0, %v4316_v4 }
  0xf5   : > { %v327_v36 = vpop.permute.xlu1 %326  ;;  %3395 = vmatprep.mubr.msk.f32.mxu0 %vm4315_vm0, %v4316_v4  ;;  %vm432_vm3 = vcmp.eq.s32.totalorder %v417_v35, %v4502_v41 }
  0xf6   : > { %vm342_vm4 = vcmp.eq.s32.totalorder %v327_v36, %v4502_v41  ;;  %v3079_v42 = vsel %vm432_vm3, 1.0, %v4316_v4  ;;  %vm2510_vm3 = vcmask 1042432  }
  0xf7   : > { %v3064_v38 = vsel %vm342_vm4, 1.0, %v4316_v4  ;;  %3444 = vmatmul.mubr.msk.f32.gmra.mrb[26].mxu1 %vm466_vm2, %v3078_v37  ;;  %vm2494_vm4 = vcmask 19456  }
  0xf8   : > { %3396 = vmatmul.mubr.msk.f32.gmra.mrb[28].mxu0 %vm466_vm2, %v3064_v38  ;;  %3446 = vmatprep.mubr.msk.f32.mxu1 %vm4315_vm0, %v4316_v4  ;;  %v4118_v39 = vpop.permute.xlu0 %4117 }
  0xf9   : > { %v4113_v43 = vpop.permute.xlu1 %4112  ;;  %3465 = vmatprep.mubr.msk.f32.mxu0 %vm4315_vm0, %v4316_v4  ;;  %v4120_v46 = vunpack.i.h.bf16 %v4118_v39  ;;  %v4119_v47 = vunpack.i.l.bf16 %v4118_v39 }
  0xfa   : > { %v4115_v44 = vunpack.i.h.bf16 %v4113_v43  ;;  %v4114_v45 = vunpack.i.l.bf16 %v4113_v43 }
  0xfb   : > { %3447 = vmatmul.mubr.msk.f32.gmra.mrb[28].mxu1 %vm466_vm2, %v3079_v42  ;;  %v3744_v52 = vpack.c.bf16 %v4120_v46, %v4119_v47  ;;  %vm884_vm2 = vcmask 523264  }
  0xfc   : > { %v3741_v48 = vpack.c.bf16 %v4115_v44, %v4114_v45  ;;  %3526 = vmatprep.mubr.msk.f32.mxu1 %vm4315_vm0, %v4316_v4  ;;  %v4128_v53 = vpop.permute.xlu0 %4127  ;;  %vm4799_vm5 = vmpackc.low %vm884_vm2, %vm884_vm2 }
  0xfd   : > { %v4123_v49 = vpop.permute.xlu1 %4122  ;;  %v4130_v55 = vunpack.i.h.bf16 %v4128_v53  ;;  %v4129_v56 = vunpack.i.l.bf16 %v4128_v53 }
  0xfe   : > { %v4125_v50 = vunpack.i.h.bf16 %v4123_v49  ;;  %v4124_v51 = vunpack.i.l.bf16 %v4123_v49  ;;  %3742 = vmatpush3.bf16.msra.mxu0 %v3741_v48 }
  0xff   : > { %3743 = vmatprep.subr.bf16.mxu0 %v4314_v1  ;;  %v3750_v57 = vpack.c.bf16 %v4130_v55, %v4129_v56 }
 0x100   : > { %v3747_v54 = vpack.c.bf16 %v4125_v50, %v4124_v51 }
 0x102   : > { %3745 = vmatpush3.bf16.msra.mxu0 %v3744_v52 }
 0x103   : > { %3746 = vmatprep.subr.bf16.mxu0 %v4314_v1 }
 0x106   : > { %3748 = vmatpush3.bf16.msra.mxu0 %v3747_v54 }
 0x107   : > { %3749 = vmatprep.subr.bf16.mxu0 %v4314_v1 }
 0x10a   : > { %3751 = vmatpush3.bf16.msra.mxu0 %v3750_v57 }
 0x10b   : > { %3764 = vmatprep.subr.bf16.mxu0 %v4314_v1 }
 0x191   : > { %v582_v58 = vpop.f32.mrb[0].mxu0 }
 0x192   : > { %v3355_v59 = vpop.f32.mrb[1].mxu0  ;;  %3527 = vmatmul.mubr.msk.f32.vlgmr.msra.gmra.mrb[30].mxu1 %vm884_vm2, %v582_v58 }
 0x193   : > { %3529 = vmatprep.mubr.msk.f32.mxu1 %vm4315_vm0, %v4316_v4 }
 0x195   : > { %v587_v60 = vpop.f32.mrb[2].mxu0 }
 0x196   : > { %v3358_v61 = vpop.f32.mrb[3].mxu0  ;;  %v767_v62 = vpop.f32.mrb[0].mxu1  ;;  %3530 = vmatmul.mubr.msk.f32.gmra.mrb[32].mxu1 %vm884_vm2, %v587_v60 }
 0x197   : > { %v3406_v63 = vpop.f32.mrb[1].mxu1  ;;  %3466 = vmatmul.mubr.msk.f32.vlgmr.msra.gmra.mrb[30].mxu0 %vm884_vm2, %v767_v62  ;;  %3532 = vmatprep.mubr.msk.f32.mxu1 %vm4315_vm0, %v4316_v4 }
 0x198   : > { %3468 = vmatprep.mubr.msk.f32.mxu0 %vm4315_vm0, %v4316_v4 }
 0x19a   : > { %v772_v0 = vpop.f32.mrb[2].mxu1 }
 0x19b   : > { %v4677_v2 = vpack.c.bf16 %v772_v0, %v767_v62  ;;  %v592_v3 = vpop.f32.mrb[4].mxu0  ;;  %v3409_v5 = vpop.f32.mrb[3].mxu1  ;;  %3469 = vmatmul.mubr.msk.f32.gmra.mrb[32].mxu0 %vm884_vm2, %v772_v0 }
 0x19c   : > { %3533 = vmatmul.mubr.msk.f32.gmra.mrb[34].mxu1 %vm884_vm2, %v592_v3  ;;  %v3361_v6 = vpop.f32.mrb[5].mxu0  ;;  %3471 = vmatprep.mubr.msk.f32.mxu0 %vm4315_vm0, %v4316_v4 }
 0x19d   : > { %3794 = vmatpush3.bf16.msra.mxu1 %v4677_v2  ;;  %3535 = vmatprep.mubr.msk.f32.mxu1 %vm4315_vm0, %v4316_v4 }
 0x19e   : > { %v777_v7 = vpop.f32.mrb[4].mxu1  ;;  %3795 = vmatprep.subr.bf16.mxu1 %v4314_v1 }
 0x19f   : > { %v597_v8 = vpop.f32.mrb[6].mxu0  ;;  %v3412_v9 = vpop.f32.mrb[5].mxu1  ;;  %3472 = vmatmul.mubr.msk.f32.gmra.mrb[34].mxu0 %vm884_vm2, %v777_v7 }
 0x1a0   : > { %v3364_v10 = vpop.f32.mrb[7].mxu0  ;;  %3536 = vmatmul.mubr.msk.f32.gmra.mrb[36].mxu1 %vm884_vm2, %v597_v8  ;;  %3474 = vmatprep.mubr.msk.f32.mxu0 %vm4315_vm0, %v4316_v4  ;;  %v4791_v9 = vld [vmem:[#allocation3 + $0x58] ss:$0 sm:$0xff] }
 0x1a1   : > { %3538 = vmatprep.mubr.msk.f32.mxu1 %vm4315_vm0, %v4316_v4 }
 0x1a2   : > { %v782_v11 = vpop.f32.mrb[6].mxu1 }
 0x1a3   : > { %v4693_v12 = vpack.c.bf16 %v782_v11, %v777_v7  ;;  %v602_v13 = vpop.f32.mrb[8].mxu0  ;;  %v3415_v14 = vpop.f32.mrb[7].mxu1  ;;  %3475 = vmatmul.mubr.msk.f32.gmra.mrb[36].mxu0 %vm884_vm2, %v782_v11 }
 0x1a4   : > { %v3367_v15 = vpop.f32.mrb[9].mxu0  ;;  %3539 = vmatmul.mubr.msk.f32.gmra.mrb[38].mxu1 %vm884_vm2, %v602_v13  ;;  %3477 = vmatprep.mubr.msk.f32.mxu0 %vm4315_vm0, %v4316_v4 }
 0x1a5   : > { %3797 = vmatpush3.bf16.msra.mxu1 %v4693_v12  ;;  %3541 = vmatprep.mubr.msk.f32.mxu1 %vm4315_vm0, %v4316_v4 }
 0x1a6   : > { %v787_v16 = vpop.f32.mrb[8].mxu1  ;;  %3798 = vmatprep.subr.bf16.mxu1 %v4314_v1 }
 0x1a7   : > { %v607_v17 = vpop.f32.mrb[10].mxu0  ;;  %v3418_v18 = vpop.f32.mrb[9].mxu1  ;;  %3478 = vmatmul.mubr.msk.f32.gmra.mrb[38].mxu0 %vm884_vm2, %v787_v16 }
 0x1a8   : > { %v3370_v19 = vpop.f32.mrb[11].mxu0  ;;  %3542 = vmatmul.mubr.msk.f32.gmra.mrb[40].mxu1 %vm884_vm2, %v607_v17  ;;  %3480 = vmatprep.mubr.msk.f32.mxu0 %vm4315_vm0, %v4316_v4 }
 0x1a9   : > { %3544 = vmatprep.mubr.msk.f32.mxu1 %vm4315_vm0, %v4316_v4 }
 0x1aa   : > { %v792_v20 = vpop.f32.mrb[10].mxu1 }
 0x1ab   : > { %v4709_v21 = vpack.c.bf16 %v792_v20, %v787_v16  ;;  %v612_v22 = vpop.f32.mrb[12].mxu0  ;;  %v3421_v23 = vpop.f32.mrb[11].mxu1  ;;  %3481 = vmatmul.mubr.msk.f32.gmra.mrb[40].mxu0 %vm884_vm2, %v792_v20 }
 0x1ac   : > { %v3373_v24 = vpop.f32.mrb[13].mxu0  ;;  %3545 = vmatmul.mubr.msk.f32.gmra.mrb[42].mxu1 %vm884_vm2, %v612_v22  ;;  %3483 = vmatprep.mubr.msk.f32.mxu0 %vm4315_vm0, %v4316_v4 }
 0x1ad   : > { %3800 = vmatpush3.bf16.msra.mxu1 %v4709_v21  ;;  %3547 = vmatprep.mubr.msk.f32.mxu1 %vm4315_vm0, %v4316_v4 }
 0x1ae   : > { %v797_v25 = vpop.f32.mrb[12].mxu1  ;;  %3801 = vmatprep.subr.bf16.mxu1 %v4314_v1 }
 0x1af   : > { %v617_v26 = vpop.f32.mrb[14].mxu0  ;;  %v3424_v27 = vpop.f32.mrb[13].mxu1  ;;  %3484 = vmatmul.mubr.msk.f32.gmra.mrb[42].mxu0 %vm884_vm2, %v797_v25 }
 0x1b0   : > { %v3376_v28 = vpop.f32.mrb[15].mxu0  ;;  %3548 = vmatmul.mubr.msk.f32.gmra.mrb[44].mxu1 %vm884_vm2, %v617_v26  ;;  %3486 = vmatprep.mubr.msk.f32.mxu0 %vm4315_vm0, %v4316_v4 }
 0x1b1   : > { %3550 = vmatprep.mubr.msk.f32.mxu1 %vm4315_vm0, %v4316_v4 }
 0x1b2   : > { %v802_v29 = vpop.f32.mrb[14].mxu1 }
 0x1b3   : > { %v4725_v30 = vpack.c.bf16 %v802_v29, %v797_v25  ;;  %v622_v31 = vpop.f32.mrb[16].mxu0  ;;  %v3427_v32 = vpop.f32.mrb[15].mxu1  ;;  %3487 = vmatmul.mubr.msk.f32.gmra.mrb[44].mxu0 %vm884_vm2, %v802_v29 }
 0x1b4   : > { %v3379_v33 = vpop.f32.mrb[17].mxu0  ;;  %3551 = vmatmul.mubr.msk.f32.gmra.mrb[46].mxu1 %vm884_vm2, %v622_v31  ;;  %3489 = vmatprep.mubr.msk.f32.mxu0 %vm4315_vm0, %v4316_v4 }
 0x1b5   : > { %3803 = vmatpush3.bf16.msra.mxu1 %v4725_v30  ;;  %3553 = vmatprep.mubr.msk.f32.mxu1 %vm4315_vm0, %v4316_v4 }
 0x1b6   : > { %v807_v34 = vpop.f32.mrb[16].mxu1  ;;  %3804 = vmatprep.subr.bf16.mxu1 %v4314_v1 }
 0x1b7   : > { %v627_v35 = vpop.f32.mrb[18].mxu0  ;;  %v3430_v36 = vpop.f32.mrb[17].mxu1  ;;  %3490 = vmatmul.mubr.msk.f32.gmra.mrb[46].mxu0 %vm884_vm2, %v807_v34 }
 0x1b8   : > { %v3382_v37 = vpop.f32.mrb[19].mxu0  ;;  %3554 = vmatmul.mubr.msk.f32.gmra.mrb[48].mxu1 %vm884_vm2, %v627_v35  ;;  %3492 = vmatprep.mubr.msk.f32.mxu0 %vm4315_vm0, %v4316_v4 }
 0x1b9   : > { %3556 = vmatprep.mubr.msk.f32.mxu1 %vm4315_vm0, %v4316_v4 }
 0x1ba   : > { %v812_v38 = vpop.f32.mrb[18].mxu1 }
 0x1bb   : > { %v4741_v39 = vpack.c.bf16 %v812_v38, %v807_v34  ;;  %v632_v42 = vpop.f32.mrb[20].mxu0  ;;  %v3433_v43 = vpop.f32.mrb[19].mxu1  ;;  %3493 = vmatmul.mubr.msk.f32.gmra.mrb[48].mxu0 %vm884_vm2, %v812_v38 }
 0x1bc   : > { %v3385_v44 = vpop.f32.mrb[21].mxu0  ;;  %3557 = vmatmul.mubr.msk.f32.gmra.mrb[50].mxu1 %vm884_vm2, %v632_v42  ;;  %3495 = vmatprep.mubr.msk.f32.mxu0 %vm4315_vm0, %v4316_v4 }
 0x1bd   : > { %3806 = vmatpush3.bf16.msra.mxu1 %v4741_v39  ;;  %3559 = vmatprep.mubr.msk.f32.mxu1 %vm4315_vm0, %v4316_v4 }
 0x1be   : > { %v817_v45 = vpop.f32.mrb[20].mxu1  ;;  %3807 = vmatprep.subr.bf16.mxu1 %v4314_v1 }
 0x1bf   : > { %v637_v46 = vpop.f32.mrb[22].mxu0  ;;  %v3436_v47 = vpop.f32.mrb[21].mxu1  ;;  %3496 = vmatmul.mubr.msk.f32.gmra.mrb[50].mxu0 %vm884_vm2, %v817_v45 }
 0x1c0   : > { %v3388_v48 = vpop.f32.mrb[23].mxu0  ;;  %3560 = vmatmul.mubr.msk.f32.gmra.mrb[52].mxu1 %vm884_vm2, %v637_v46  ;;  %3498 = vmatprep.mubr.msk.f32.mxu0 %vm4315_vm0, %v4316_v4 }
 0x1c1   : > { %3562 = vmatprep.mubr.msk.f32.mxu1 %vm4315_vm0, %v4316_v4 }
 0x1c2   : > { %v822_v49 = vpop.f32.mrb[22].mxu1 }
 0x1c3   : > { %v4757_v50 = vpack.c.bf16 %v822_v49, %v817_v45  ;;  %v642_v51 = vpop.f32.mrb[24].mxu0  ;;  %v3439_v52 = vpop.f32.mrb[23].mxu1  ;;  %3499 = vmatmul.mubr.msk.f32.gmra.mrb[52].mxu0 %vm884_vm2, %v822_v49 }
 0x1c4   : > { %v3391_v53 = vpop.f32.mrb[25].mxu0  ;;  %3563 = vmatmul.mubr.msk.f32.gmra.mrb[54].mxu1 %vm884_vm2, %v642_v51  ;;  %3501 = vmatprep.mubr.msk.f32.mxu0 %vm4315_vm0, %v4316_v4 }
 0x1c5   : > { %3809 = vmatpush3.bf16.msra.mxu1 %v4757_v50  ;;  %3565 = vmatprep.mubr.msk.f32.mxu1 %vm4315_vm0, %v4316_v4 }
 0x1c6   : > { %v827_v54 = vpop.f32.mrb[24].mxu1  ;;  %3810 = vmatprep.subr.bf16.mxu1 %v4314_v1 }
 0x1c7   : > { %v647_v55 = vpop.f32.mrb[26].mxu0  ;;  %v3442_v56 = vpop.f32.mrb[25].mxu1  ;;  %3502 = vmatmul.mubr.msk.f32.gmra.mrb[54].mxu0 %vm884_vm2, %v827_v54 }
 0x1c8   : > { %v3394_v57 = vpop.f32.mrb[27].mxu0  ;;  %3566 = vmatmul.mubr.msk.f32.gmra.mrb[56].mxu1 %vm884_vm2, %v647_v55  ;;  %3504 = vmatprep.mubr.msk.f32.mxu0 %vm4315_vm0, %v4316_v4 }
 0x1c9   : > { %3568 = vmatprep.mubr.msk.f32.mxu1 %vm4315_vm0, %v4316_v4 }
 0x1ca   : > { %v832_v58 = vpop.f32.mrb[26].mxu1 }
 0x1cb   : > { %v4773_v59 = vpack.c.bf16 %v832_v58, %v827_v54  ;;  %v652_v60 = vpop.f32.mrb[28].mxu0  ;;  %v3445_v61 = vpop.f32.mrb[27].mxu1  ;;  %3505 = vmatmul.mubr.msk.f32.gmra.mrb[56].mxu0 %vm884_vm2, %v832_v58 }
 0x1cc   : > { %v3397_v62 = vpop.f32.mrb[29].mxu0  ;;  %3569 = vmatmul.mubr.msk.f32.gmra.mrb[58].mxu1 %vm884_vm2, %v652_v60  ;;  %3507 = vmatprep.mubr.msk.f32.mxu0 %vm4315_vm0, %v4316_v4 }
 0x1cd   : > { %3812 = vmatpush3.bf16.msra.mxu1 %v4773_v59  ;;  %3634 = vmatprep.mubr.msk.f32.mxu1 %vm4315_vm0, %v4316_v4 }
 0x1ce   : > { %v4782_v63 = vpop.f32.mrb[28].mxu1  ;;  %3632 = vmatprep.subr.mxu1 %v4316_v4 }
 0x1cf   : > { %v3448_v0 = vpop.f32.mrb[29].mxu1  ;;  %3508 = vmatmul.mubr.msk.f32.gmra.mrb[58].mxu0 %vm884_vm2, %v4782_v63 }
 0x1d0   : > { %3601 = vmatprep.mubr.msk.f32.mxu0 %vm4315_vm0, %v4316_v4 }
 0x1d1   : > { %3633 = vmatpush3.msra.mxu1 %v4782_v63 }
 0x1d2   : > { %3834 = vmatprep.subr.bf16.mxu1 %v4314_v1 }
 0x265   : > { %v1181_v3 = vpop.f32.mrb[30].mxu1 }
 0x266   : > { %v3528_v5 = vpop.f32.mrb[31].mxu1 }
 0x269   : > { %v1186_v6 = vpop.f32.mrb[32].mxu1 }
 0x26a   : > { %v996_v7 = vpop.f32.mrb[30].mxu0  ;;  %v3531_v8 = vpop.f32.mrb[33].mxu1 }
 0x26b   : > { %v1182_v10 = vadd.f32 %v1181_v3, %v996_v7  ;;  %v3467_v11 = vpop.f32.mrb[31].mxu0 }
 0x26d   : > { %v1259_v13 = vadd.f32 %v4791_v9, %v1182_v10 }
 0x26e   : > { %v1001_v14 = vpop.f32.mrb[32].mxu0 }
 0x26f   : > { %v1187_v15 = vadd.f32 %v1186_v6, %v1001_v14  ;;  %v3470_v16 = vpop.f32.mrb[33].mxu0  ;;  %v1191_v17 = vpop.f32.mrb[34].mxu1  ;;  %4132 = vtanh.f32 %v1259_v13 }
 0x270   : > { %v3534_v18 = vpop.f32.mrb[35].mxu1 }
 0x271   : > { %v1260_v19 = vadd.f32 %v4791_v9, %v1187_v15 }
 0x272   : > { %v1006_v20 = vpop.f32.mrb[34].mxu0 }
 0x273   : > { %4134 = vtanh.f32 %v1260_v19  ;;  %v1192_v22 = vadd.f32 %v1191_v17, %v1006_v20  ;;  %v3473_v23 = vpop.f32.mrb[35].mxu0  ;;  %v1196_v24 = vpop.f32.mrb[36].mxu1 }
 0x274   : > { %v3537_v25 = vpop.f32.mrb[37].mxu1 }
 0x275   : > { %v1261_v26 = vadd.f32 %v4791_v9, %v1192_v22 }
 0x276   : > { %v1011_v27 = vpop.f32.mrb[36].mxu0 }
 0x277   : > { %v1197_v28 = vadd.f32 %v1196_v24, %v1011_v27  ;;  %v3476_v29 = vpop.f32.mrb[37].mxu0  ;;  %v1201_v31 = vpop.f32.mrb[38].mxu1  ;;  %4136 = vtanh.f32 %v1261_v26 }
 0x278   : > { %v3540_v32 = vpop.f32.mrb[39].mxu1 }
 0x279   : > { %v1262_v33 = vadd.f32 %v4791_v9, %v1197_v28  ;;  %v4133_v38 = vpop.eup %4132 }
 0x27a   : > { %v1016_v34 = vpop.f32.mrb[38].mxu0 }
 0x27b   : > { %4138 = vtanh.f32 %v1262_v33  ;;  %v1202_v35 = vadd.f32 %v1201_v31, %v1016_v34  ;;  %v3479_v36 = vpop.f32.mrb[39].mxu0  ;;  %v1206_v37 = vpop.f32.mrb[40].mxu1 }
 0x27c   : > { %v3543_v42 = vpop.f32.mrb[41].mxu1 }
 0x27d   : > { %v4135_v43 = vpop.eup %4134  ;;  %v1263_v45 = vadd.f32 %v4791_v9, %v1202_v35 }
 0x27e   : > { %v1021_v46 = vpop.f32.mrb[40].mxu0  ;;  %v3765_v47 = vpack.c.bf16 %v4135_v43, %v4133_v38 }
 0x27f   : > { %v1207_v48 = vadd.f32 %v1206_v37, %v1021_v46  ;;  %v3482_v49 = vpop.f32.mrb[41].mxu0  ;;  %v1211_v51 = vpop.f32.mrb[42].mxu1  ;;  %4140 = vtanh.f32 %v1263_v45 }
 0x280   : > { %v3546_v52 = vpop.f32.mrb[43].mxu1  ;;  %3767 = vmatpush3.bf16.xpose.msk.msra.mxu0 %vm4799_vm5, %v3765_v47 }
 0x281   : > { %v1264_v53 = vadd.f32 %v4791_v9, %v1207_v48  ;;  %3768 = vmatprep.subr.bf16.mxu0 %v4314_v1  ;;  %v4137_v58 = vpop.eup %4136 }
 0x282   : > { %v1026_v54 = vpop.f32.mrb[42].mxu0 }
 0x283   : > { %4142 = vtanh.f32 %v1264_v53  ;;  %v1212_v55 = vadd.f32 %v1211_v51, %v1026_v54  ;;  %v3485_v56 = vpop.f32.mrb[43].mxu0  ;;  %v1216_v57 = vpop.f32.mrb[44].mxu1 }
 0x284   : > { %v3549_v60 = vpop.f32.mrb[45].mxu1 }
 0x285   : > { %v4139_v61 = vpop.eup %4138  ;;  %v1265_v62 = vadd.f32 %v4791_v9, %v1212_v55 }
 0x286   : > { %v1031_v0 = vpop.f32.mrb[44].mxu0  ;;  %v3769_v3 = vpack.c.bf16 %v4139_v61, %v4137_v58 }
 0x287   : > { %v1217_v5 = vadd.f32 %v1216_v57, %v1031_v0  ;;  %v3488_v6 = vpop.f32.mrb[45].mxu0  ;;  %v1221_v7 = vpop.f32.mrb[46].mxu1  ;;  %4144 = vtanh.f32 %v1265_v62 }
 0x288   : > { %v3552_v8 = vpop.f32.mrb[47].mxu1  ;;  %3771 = vmatpush3.bf16.xpose.msk.msra.mxu0 %vm4799_vm5, %v3769_v3 }
 0x289   : > { %v1266_v10 = vadd.f32 %v4791_v9, %v1217_v5  ;;  %3772 = vmatprep.subr.bf16.mxu0 %v4314_v1  ;;  %v4141_v16 = vpop.eup %4140 }
 0x28a   : > { %v1036_v11 = vpop.f32.mrb[46].mxu0 }
 0x28b   : > { %4146 = vtanh.f32 %v1266_v10  ;;  %v1222_v13 = vadd.f32 %v1221_v7, %v1036_v11  ;;  %v3491_v14 = vpop.f32.mrb[47].mxu0  ;;  %v1226_v15 = vpop.f32.mrb[48].mxu1 }
 0x28c   : > { %v3555_v17 = vpop.f32.mrb[49].mxu1 }
 0x28d   : > { %v4143_v18 = vpop.eup %4142  ;;  %v1267_v19 = vadd.f32 %v4791_v9, %v1222_v13 }
 0x28e   : > { %v1041_v20 = vpop.f32.mrb[48].mxu0  ;;  %v3773_v22 = vpack.c.bf16 %v4143_v18, %v4141_v16  ;;  %v850_v18 = vld [vmem:[#allocation3 + $0x59] sm:$0x3] }
 0x28f   : > { %v1227_v23 = vadd.f32 %v1226_v15, %v1041_v20  ;;  %v3494_v24 = vpop.f32.mrb[49].mxu0  ;;  %v1231_v25 = vpop.f32.mrb[50].mxu1  ;;  %4148 = vtanh.f32 %v1267_v19 }
 0x290   : > { %v3558_v26 = vpop.f32.mrb[51].mxu1  ;;  %3775 = vmatpush3.bf16.xpose.msk.msra.mxu0 %vm4799_vm5, %v3773_v22 }
 0x291   : > { %v1268_v27 = vadd.f32 %v4791_v9, %v1227_v23  ;;  %3776 = vmatprep.subr.bf16.mxu0 %v4314_v1  ;;  %v4145_v33 = vpop.eup %4144 }
 0x292   : > { %v1046_v28 = vpop.f32.mrb[50].mxu0 }
 0x293   : > { %4150 = vtanh.f32 %v1268_v27  ;;  %v1232_v29 = vadd.f32 %v1231_v25, %v1046_v28  ;;  %v3497_v31 = vpop.f32.mrb[51].mxu0  ;;  %v1236_v32 = vpop.f32.mrb[52].mxu1 }
 0x294   : > { %v3561_v34 = vpop.f32.mrb[53].mxu1 }
 0x295   : > { %v4147_v35 = vpop.eup %4146  ;;  %v1269_v36 = vadd.f32 %v4791_v9, %v1232_v29 }
 0x296   : > { %v1051_v37 = vpop.f32.mrb[52].mxu0  ;;  %v3777_v38 = vpack.c.bf16 %v4147_v35, %v4145_v33  ;;  %v1616_v35 = vld [vmem:[#allocation3 + $0x60] sm:$0xff] }
 0x297   : > { %v1237_v42 = vadd.f32 %v1236_v32, %v1051_v37  ;;  %v3500_v43 = vpop.f32.mrb[53].mxu0  ;;  %v1241_v45 = vpop.f32.mrb[54].mxu1  ;;  %4152 = vtanh.f32 %v1269_v36  ;;  %v1617_v36 = vld [vmem:[#allocation3 + $0x68] sm:$0xff]  ;;  %v1618_v37 = vld [vmem:[#allocation3 + $0x70] sm:$0xff] }
 0x298   : > { %v3564_v46 = vpop.f32.mrb[55].mxu1  ;;  %3779 = vmatpush3.bf16.xpose.msk.msra.mxu0 %vm4799_vm5, %v3777_v38  ;;  %v3835_v38 = vpack.c.bf16 %v1617_v36, %v1616_v35 }
 0x299   : > { %v1270_v47 = vadd.f32 %v4791_v9, %v1237_v42  ;;  %3780 = vmatprep.subr.bf16.mxu0 %v4314_v1  ;;  %v4149_v53 = vpop.eup %4148  ;;  %v1619_v42 = vld [vmem:[#allocation3 + $0x78] sm:$0xff] }
 0x29a   : > { %v1056_v48 = vpop.f32.mrb[54].mxu0  ;;  %v3838_v43 = vpack.c.bf16 %v1619_v42, %v1618_v37  ;;  %v1863_v37 = vld [vmem:[%s5414_s3 + $0x108] sm:$0xff]  ;;  %v1862_v42 = vld [vmem:[%s5414_s3 + $0x100] sm:$0xff] }
 0x29b   : > { %4154 = vtanh.f32 %v1270_v47  ;;  %v1242_v49 = vadd.f32 %v1241_v45, %v1056_v48  ;;  %v3503_v51 = vpop.f32.mrb[55].mxu0  ;;  %v1246_v52 = vpop.f32.mrb[56].mxu1 }
 0x29c   : > { %v3567_v54 = vpop.f32.mrb[57].mxu1  ;;  %v1621_v51 = vld [vmem:[#allocation3 + $0x88] sm:$0xff] }
 0x29d   : > { %v4151_v55 = vpop.eup %4150  ;;  %v1271_v56 = vadd.f32 %v4791_v9, %v1242_v49  ;;  %v1620_v49 = vld [vmem:[#allocation3 + $0x80] sm:$0xff] }
 0x29e   : > { %v1061_v57 = vpop.f32.mrb[56].mxu0  ;;  %v3781_v58 = vpack.c.bf16 %v4151_v55, %v4149_v53 }
 0x29f   : > { %v1247_v60 = vadd.f32 %v1246_v52, %v1061_v57  ;;  %v3506_v61 = vpop.f32.mrb[57].mxu0  ;;  %v1251_v62 = vpop.f32.mrb[58].mxu1  ;;  %4156 = vtanh.f32 %v1271_v56  ;;  %v3841_v56 = vpack.c.bf16 %v1621_v51, %v1620_v49  ;;  %v1622_v57 = vld [vmem:[#allocation3 + $0x90] sm:$0xff] }
 0x2a0   : > { %v3570_v0 = vpop.f32.mrb[59].mxu1  ;;  %3783 = vmatpush3.bf16.xpose.msk.msra.mxu0 %vm4799_vm5, %v3781_v58  ;;  %v1623_v58 = vld [vmem:[#allocation3 + $0x98] sm:$0xff] }
 0x2a1   : > { %v1272_v3 = vadd.f32 %v4791_v9, %v1247_v60  ;;  %3784 = vmatprep.subr.bf16.mxu0 %v4314_v1  ;;  %v4153_v8 = vpop.eup %4152  ;;  %v1610_v60 = vld [vmem:[%s261_s14] sm:$0x7]  ;;  %v3844_v0 = vpack.c.bf16 %v1623_v58, %v1622_v57 }
 0x2a2   : > { %v1066_v5 = vpop.f32.mrb[58].mxu0  ;;  %1612 = vst.msk [vmem:[#allocation2] sm:$0x7] %vm1611_vm11, %v1610_v60  ;;  %v1874_v57 = vld [vmem:[%s5414_s3 + $0x160] sm:$0xff]  ;;  %v1879_v60 = vld [vmem:[%s5414_s3 + $0x188] sm:$0xff] }
 0x2a3   : > { %4158 = vtanh.f32 %v1272_v3  ;;  %v1252_v6 = vadd.f32 %v1251_v62, %v1066_v5  ;;  %v3509_v7 = vpop.f32.mrb[59].mxu0 }
 0x2a4   : > { %v1625_v7 = vld [vmem:[#allocation3 + $0xa8] sm:$0xff] }
 0x2a5   : > { %v4155_v10 = vpop.eup %4154  ;;  %v1273_v13 = vadd.f32 %v4791_v9, %v1252_v6 }
 0x2a6   : > { %v3785_v11 = vpack.c.bf16 %v4155_v10, %v4153_v8  ;;  %v1626_v8 = vld [vmem:[#allocation3 + $0xb0] sm:$0xff] }
 0x2a7   : > { %4160 = vtanh.f32 %v1273_v13  ;;  %v3847_v10 = vpack.c.bf16 %v1626_v8, %v1625_v7  ;;  %v1628_v13 = vld [vmem:[#allocation3 + $0xc0] sm:$0xff] }
 0x2a8   : > { %3787 = vmatpush3.bf16.xpose.msk.msra.mxu0 %vm4799_vm5, %v3785_v11  ;;  %v1627_v11 = vld [vmem:[#allocation3 + $0xb8] sm:$0xff]  ;;  %v1891_v7 = vld [vmem:[%s5414_s3 + $0x1e8] sm:$0xff] }
 0x2a9   : > { %3788 = vmatprep.subr.bf16.mxu0 %v4314_v1  ;;  %v4157_v14 = vpop.eup %4156 }
 0x2ad   : > { %v4159_v15 = vpop.eup %4158 }
 0x2ae   : > { %v3789_v16 = vpack.c.bf16 %v4159_v15, %v4157_v14  ;;  %v3850_v15 = vpack.c.bf16 %v1628_v13, %v1627_v11  ;;  %v1890_v11 = vld [vmem:[%s5414_s3 + $0x1e0] sm:$0xff] }
 0x2b0   : > { %3791 = vmatpush3.bf16.xpose.msk.msra.mxu0 %vm4799_vm5, %v3789_v16  ;;  %v1629_v16 = vld [vmem:[#allocation3 + $0xc8] sm:$0xff] }
 0x2b1   : > { %3599 = vmatprep.subr.mxu0 %v4316_v4  ;;  %v4161_v17 = vpop.eup %4160 }
 0x2b8   : > { %3600 = vmatpush3.xpose.msk.msra.mxu0 %vm884_vm2, %v4161_v17  ;;  %v1630_v17 = vld [vmem:[#allocation3 + $0xd0] sm:$0xff] }
 0x2b9   : > { %3813 = vmatprep.subr.bf16.mxu0 %v4314_v1 }
 0x2bb   : > { %3602 = vmatmul.mubr.msk.f32.vlgmr.msra.gmra.mrb[60].mxu0 %vm884_vm2, %v850_v18  ;;  %v3853_v18 = vpack.c.bf16 %v1630_v17, %v1629_v16  ;;  %v1894_v17 = vld [vmem:[%s5414_s3 + $0x200] sm:$0xff] }
 0x2bc   : > { %3815 = vmatpush3.bf16.msra.mxu0 %v4677_v2  ;;  %3667 = vmatprep.mubr.msk.f32.mxu0 %vm4315_vm0, %v4316_v4  ;;  %v4856_v2 = vshrl.u32 %v281_v40, 7 }
 0x2bd   : > { %3816 = vmatprep.subr.bf16.mxu0 %v4314_v1 }
 0x2c0   : > { %3818 = vmatpush3.bf16.msra.mxu0 %v4693_v12  ;;  %v1416_v12 = vadd.s32 1, %v4856_v2 }
 0x2c1   : > { %3819 = vmatprep.subr.bf16.mxu0 %v4314_v1 }
 0x2c4   : > { %3821 = vmatpush3.bf16.msra.mxu0 %v4709_v21  ;;  %v1414_v21 = vmul.u32 30, %v4856_v2 }
 0x2c5   : > { %3822 = vmatprep.subr.bf16.mxu0 %v4314_v1 }
 0x2c6   : > { %vm1415_vm6 = vcmp.ge.s32.totalorder %v4502_v41, %v1414_v21  ;;  %v1632_v21 = vld [vmem:[#allocation3 + $0xe0] sm:$0xff] }
 0x2c8   : > { %3824 = vmatpush3.bf16.msra.mxu0 %v4725_v30  ;;  %v1417_v30 = vmul.u32 30, %v1416_v12  ;;  %v1631_v12 = vld [vmem:[#allocation3 + $0xd8] sm:$0xff] }
 0x2c9   : > { %3825 = vmatprep.subr.bf16.mxu0 %v4314_v1 }
 0x2ca   : > { %vm1418_vm7 = vcmp.lt.s32.totalorder %v4502_v41, %v1417_v30  ;;  %v3856_v30 = vpack.c.bf16 %v1632_v21, %v1631_v12  ;;  %v1903_v21 = vld [vmem:[%s5414_s3 + $0x248] sm:$0xff] }
 0x2cb   : > { %vm1419_vm8 = vmand %vm1415_vm6, %vm1418_vm7 }
 0x2cc   : > { %3827 = vmatpush3.bf16.msra.mxu0 %v4741_v39  ;;  %v1422_v39 = vsub.s32 0, %v4856_v2 }
 0x2cd   : > { %3828 = vmatprep.subr.bf16.mxu0 %v4314_v1 }
 0x2d0   : > { %3830 = vmatpush3.bf16.msra.mxu0 %v4757_v50  ;;  %v1514_v50 = vsub.s32 1, %v4856_v2 }
 0x2d1   : > { %3831 = vmatprep.subr.bf16.mxu0 %v4314_v1 }
 0x2d4   : > { %3833 = vmatpush3.bf16.msra.mxu0 %v4773_v59  ;;  %v1292_v59 = vpop.permute.xlu1 %1291 }
 0x2d5   : > { %3665 = vmatprep.subr.mxu0 %v4316_v4 }
 0x2d8   : > { %3666 = vmatpush3.msra.mxu0 %v4782_v63 }
 0x38e   : > { %v1408_v9 = vpop.f32.mrb[60].mxu0 }
 0x38f   : > { %v1409_v44 = vadd.f32 %v1408_v9, %v1292_v59  ;;  %v3603_v63 = vpop.f32.mrb[61].mxu0  ;;  %v1633_v59 = vld [vmem:[#allocation3 + $0xe8] sm:$0xff]  ;;  %v1634_v9 = vld [vmem:[#allocation3 + $0xf0] sm:$0xff] }
 0x390   : > { %v1635_v63 = vld [vmem:[#allocation3 + $0xf8] sm:$0xff] }
 0x391   : > { %v1423_v40 = vrot.slane %v1409_v44, %v1422_v39  ;;  %v1515_v19 = vrot.slane %v1409_v44, %v1514_v50  ;;  %v3859_v44 = vpack.c.bf16 %v1634_v9, %v1633_v59  ;;  %v1902_v9 = vld [vmem:[%s5414_s3 + $0x240] sm:$0xff] }
 0x393   : > { %v1516_v20 = vsel %vm1419_vm8, %v1515_v19, -1e+30  ;;  %v1424_v22 = vsel %vm1419_vm8, %v1423_v40, -1e+30  ;;  %v1636_v40 = vld [vmem:[#allocation3 + $0x100] sm:$0xff] }
 0x394   : > { %v1517_v23 = vsel %vm1425_vm9, %v1516_v20, -inf  ;;  %v1426_v24 = vsel %vm1425_vm9, %v1424_v22, -inf  ;;  %v3862_v19 = vpack.c.bf16 %v1636_v40, %v1635_v63  ;;  %v1831_v40 = vld [vmem:[%s5414_s3 + $0x8] sm:$0xff] }
 0x395   : > { %1518 = vmax.xlane.f32.xlu0 %v1517_v23  ;;  %1427 = vmax.xlane.f32.xlu1 %v1426_v24  ;;  %v1639_v24 = vld [vmem:[#allocation3 + $0x118] sm:$0xff] }
 0x422   : > { %v1519_v41 = vpop.xlane.xlu0 %1518  ;;  %v1428_v25 = vpop.xlane.xlu1 %1427 }
 0x423   : > { %v1520_v26 = vsub.f32 %v1516_v20, %v1519_v41  ;;  %v1429_v27 = vsub.f32 %v1424_v22, %v1428_v25  ;;  %v1637_v20 = vld [vmem:[#allocation3 + $0x108] sm:$0xff]  ;;  %v1638_v22 = vld [vmem:[#allocation3 + $0x110] sm:$0xff]  ;;  %v1640_v41 = vld [vmem:[#allocation3 + $0x120] sm:$0xff] }
 0x424   : > { %v3865_v23 = vpack.c.bf16 %v1638_v22, %v1637_v20  ;;  %v3868_v25 = vpack.c.bf16 %v1640_v41, %v1639_v24  ;;  %v1830_v20 = vld [vmem:[%s5414_s3] sm:$0xff]  ;;  %v1911_v24 = vld [vmem:[%s5414_s3 + $0x288] sm:$0xff] }
 0x425   : > { %v1521_v28 = vmul.f32 1.442695, %v1520_v26  ;;  %v1430_v29 = vmul.f32 1.442695, %v1429_v27  ;;  %v3161_v26 = vld [vmem:[#allocation3 + $0xa0] ss:$0 sm:$0xff] }
 0x426   : > { %v1915_v41 = vld [vmem:[%s5414_s3 + $0x2a8] sm:$0xff] }
 0x427   : > { %4162 = vpow2.f32 %v1521_v28 }
 0x428   : > { %4164 = vpow2.f32 %v1430_v29 }
 0x431   : > { %v4163_v31 = vpop.eup %4162 }
 0x432   : > { %v4165_v32 = vpop.eup %4164  ;;  %3668 = vmatmul.mubr.msk.f32.vlgmr.msra.gmra.mrb[62].mxu0 %vm1432_vm10, %v4163_v31  ;;  %v1596_v33 = vsel %vm1425_vm9, %v4163_v31, 0.0 }
 0x433   : > { %3635 = vmatmul.mubr.msk.f32.vlgmr.msra.gmra.mrb[60].mxu1 %vm1432_vm10, %v4165_v32  ;;  %1597 = vadd.xlane.f32.xlu0 %v1596_v33  ;;  %v1506_v34 = vsel %vm1425_vm9, %v4165_v32, 0.0  ;;  %v3163_v32 = vld [vmem:[#allocation3 + $0x128] ss:$0 sm:$0xff] }
 0x434   : > { %3686 = vmatprep.mubr.msk.f32.mxu1 %vm4315_vm0, %v4316_v4  ;;  %2017 = vmatprep.mubr.f32.mxu0 %v4316_v4 }
 0x435   : > { %3836 = vmatpush3.bf16.msra.mxu1 %v3835_v38  ;;  %v1867_v38 = vld [vmem:[%s5414_s3 + $0x128] sm:$0xff] }
 0x436   : > { %3837 = vmatprep.subr.bf16.mxu1 %v4314_v1 }
 0x437   : > { %1507 = vadd.xlane.f32.xlu0 %v1506_v34 }
 0x439   : > { %3839 = vmatpush3.bf16.msra.mxu1 %v3838_v43  ;;  %v4911_v43 = vpack.c.bf16 %v1867_v38, %v1863_v37  ;;  %v1923_v37 = vld [vmem:[%s5414_s3 + $0x2e8] sm:$0xff]  ;;  %v1918_v38 = vld [vmem:[%s5414_s3 + $0x2c0] sm:$0xff] }
 0x43a   : > { %3840 = vmatprep.subr.bf16.mxu1 %v4314_v1 }
 0x43d   : > { %3842 = vmatpush3.bf16.msra.mxu1 %v3841_v56  ;;  %v1870_v56 = vld [vmem:[%s5414_s3 + $0x140] sm:$0xff] }
 0x43e   : > { %3843 = vmatprep.subr.bf16.mxu1 %v4314_v1  ;;  %v4939_v58 = vpack.c.bf16 %v1874_v57, %v1870_v56  ;;  %v1855_v56 = vld [vmem:[%s5414_s3 + $0xc8] sm:$0xff] }
 0x43f   : > { %v1859_v57 = vld [vmem:[%s5414_s3 + $0xe8] sm:$0xff] }
 0x441   : > { %3845 = vmatpush3.bf16.msra.mxu1 %v3844_v0  ;;  %v1878_v0 = vld [vmem:[%s5414_s3 + $0x180] sm:$0xff] }
 0x442   : > { %3846 = vmatprep.subr.bf16.mxu1 %v4314_v1 }
 0x4c0   : > { %v1598_v45 = vpop.xlane.xlu0 %1597 }
 0x4c1   : > { %4166 = vrcp.f32 %v1598_v45  ;;  %v1866_v45 = vld [vmem:[%s5414_s3 + $0x120] sm:$0xff] }
 0x4c4   : > { %v1508_v46 = vpop.xlane.xlu0 %1507 }
 0x4c5   : > { %4168 = vrcp.f32 %v1508_v46  ;;  %v4916_v46 = vpack.c.bf16 %v1866_v45, %v1862_v42  ;;  %v1922_v45 = vld [vmem:[%s5414_s3 + $0x2e0] sm:$0xff] }
 0x4cb   : > { %v4167_v47 = vpop.eup %4166 }
 0x4cf   : > { %v4169_v52 = vpop.eup %4168 }
 0x505   : > { %v1592_v48 = vpop.f32.mrb[62].mxu0 }
 0x506   : > { %v1502_v53 = vpop.f32.mrb[60].mxu1  ;;  %v1600_v54 = vmul.f32 %v4167_v47, %v1592_v48  ;;  %v3669_v55 = vpop.f32.mrb[63].mxu0 }
 0x507   : > { %v1510_v61 = vmul.f32 %v4169_v52, %v1502_v53  ;;  %v3636_v62 = vpop.f32.mrb[61].mxu1  ;;  %v1871_v53 = vld [vmem:[%s5414_s3 + $0x148] sm:$0xff] }
 0x508   : > { %4170 = vtanh.f32 %v1600_v54  ;;  %v1875_v54 = vld [vmem:[%s5414_s3 + $0x168] sm:$0xff] }
 0x509   : > { %4172 = vtanh.f32 %v1510_v61  ;;  %v4931_v55 = vpack.c.bf16 %v1875_v54, %v1871_v53  ;;  %v1883_v61 = vld [vmem:[%s5414_s3 + $0x1a8] sm:$0xff]  ;;  %v1846_v53 = vld [vmem:[%s5414_s3 + $0x80] sm:$0xff] }
 0x50a   : > { %v4949_v62 = vpack.c.bf16 %v1883_v61, %v1879_v60  ;;  %v1850_v54 = vld [vmem:[%s5414_s3 + $0xa0] sm:$0xff]  ;;  %v3882_v61 = vpack.c.bf16 %v1859_v57, %v1855_v56  ;;  %v1860_v56 = vld [vmem:[%s5414_s3 + $0xf0] sm:$0xff]  ;;  %v1865_v57 = vld [vmem:[%s5414_s3 + $0x118] sm:$0xff] }
 0x50b   : > { %v3880_v60 = vpack.c.bf16 %v1850_v54, %v1846_v53  ;;  %v1856_v54 = vld [vmem:[%s5414_s3 + $0xd0] sm:$0xff] }
 0x512   : > { %v4171_v3 = vpop.eup %4170 }
 0x513   : > { %v4173_v5 = vpop.eup %4172  ;;  %1605 = vrot.lane.b32.xlu1 %v4171_v3, %s4319_s17  ;;  %v1882_v3 = vld [vmem:[%s5414_s3 + $0x1a0] sm:$0xff]  ;;  %s265_s17 = scalar_lea.vmem %s5416_s5, %s3049_s8  ;;  %s4242_s8 = scalar_lea.vmem %s5368_s25, 64 }
 0x514   : > { %1603 = vst.msk [vmem:[%s4886_s23] sm:$0xf] %vm1602_vm12, %v4173_v5  ;;  %1613 = vst.msk [vmem:[#allocation2 + $0x3] sm:$0xf] %vm1602_vm12, %v4173_v5  ;;  %v4957_v5 = vpack.c.bf16 %v1882_v3, %v1878_v0  ;;  %v1854_v0 = vld [vmem:[%s5414_s3 + $0xc0] sm:$0xff]  ;;  %p4243_p6 = scmp.ne.s32.totalorder %s5368_s25, %s4242_s8 }
 0x515   : > { %v1858_v3 = vld [vmem:[%s5414_s3 + $0xe0] sm:$0xff] }
 0x516   : > { %p4244_p10 = pnand %p4243_p6, %p5429_p9 }
 0x518   : > { %p4245_p12 = pneg %p4244_p10 }
 0x585   : > { %v1606_v6 = vpop.permute.xlu1 %1605 }
 0x586   : > { %1609 = vst.msk [vmem:[%s4886_s23] sm:$0xf] %vm1608_vm13, %v1606_v6  ;;  %1614 = vst.msk [vmem:[#allocation2 + $0x3] sm:$0xf] %vm1608_vm13, %v1606_v6  ;;  %v1887_v6 = vld [vmem:[%s5414_s3 + $0x1c8] sm:$0xff] }
 0x587   : > { %v4967_v8 = vpack.c.bf16 %v1891_v7, %v1887_v6  ;;  %v3884_v6 = vpack.c.bf16 %v1858_v3, %v1854_v0  ;;  %v1833_v7 = vld [vmem:[%s5414_s3 + $0x18] sm:$0xff]  ;;  %v1864_v3 = vld [vmem:[%s5414_s3 + $0x110] sm:$0xff] }
 0x58d   : > { %v1615_v14 = vld [vmem:[#allocation2] sm:$0x7f] }
 0x58e   : > { %3687 = vmatmul.mubr.msk.f32.vlgmr.msra.gmra.mrb[62].mxu1 %vm884_vm2, %v1615_v14 }
 0x58f   : > { %3848 = vmatpush3.bf16.msra.mxu1 %v3847_v10  ;;  %3721 = vmatprep.mubr.msk.f32.mxu1 %vm4315_vm0, %v4316_v4  ;;  %v1886_v10 = vld [vmem:[%s5414_s3 + $0x1c0] sm:$0xff] }
 0x590   : > { %3849 = vmatprep.subr.bf16.mxu1 %v4314_v1  ;;  %v4975_v13 = vpack.c.bf16 %v1890_v11, %v1886_v10  ;;  %v1837_v10 = vld [vmem:[%s5414_s3 + $0x38] sm:$0xff] }
 0x591   : > { %v3886_v11 = vpack.c.bf16 %v1837_v10, %v1833_v7  ;;  %v1873_v7 = vld [vmem:[%s5414_s3 + $0x158] sm:$0xff] }
 0x592   : > { %v1877_v10 = vld [vmem:[%s5414_s3 + $0x178] sm:$0xff] }
 0x593   : > { %3851 = vmatpush3.bf16.msra.mxu1 %v3850_v15  ;;  %v1899_v15 = vld [vmem:[%s5414_s3 + $0x228] sm:$0xff] }
 0x594   : > { %3852 = vmatprep.subr.bf16.mxu1 %v4314_v1 }
 0x597   : > { %3854 = vmatpush3.bf16.msra.mxu1 %v3853_v18  ;;  %v1898_v18 = vld [vmem:[%s5414_s3 + $0x220] sm:$0xff] }
 0x598   : > { %3855 = vmatprep.subr.bf16.mxu1 %v4314_v1  ;;  %v4993_v12 = vpack.c.bf16 %v1898_v18, %v1894_v17 }
 0x59b   : > { %3857 = vmatpush3.bf16.msra.mxu1 %v3856_v30  ;;  %v1907_v30 = vld [vmem:[%s5414_s3 + $0x268] sm:$0xff] }
 0x59c   : > { %3858 = vmatprep.subr.bf16.mxu1 %v4314_v1  ;;  %v5005_v59 = vpack.c.bf16 %v1907_v30, %v1903_v21 }
 0x59f   : > { %3860 = vmatpush3.bf16.msra.mxu1 %v3859_v44  ;;  %v1906_v44 = vld [vmem:[%s5414_s3 + $0x260] sm:$0xff] }
 0x5a0   : > { %3861 = vmatprep.subr.bf16.mxu1 %v4314_v1  ;;  %v5013_v63 = vpack.c.bf16 %v1906_v44, %v1902_v9 }
 0x5a3   : > { %3863 = vmatpush3.bf16.msra.mxu1 %v3862_v19  ;;  %v1835_v19 = vld [vmem:[%s5414_s3 + $0x28] sm:$0xff] }
 0x5a4   : > { %3864 = vmatprep.subr.bf16.mxu1 %v4314_v1  ;;  %v3870_v22 = vpack.c.bf16 %v1835_v19, %v1831_v40  ;;  %v3164_v19 = vld [vmem:[#allocation3 + $0x5d] ss:$0 sm:$0xff] }
 0x5a6   : > { %3871 = vmatprep.subr.bf16.mxu0 %v3870_v22  ;;  %v3165_v22 = vld [vmem:[#allocation3 + $0x5e] ss:$0 sm:$0xff] }
 0x5a7   : > { %3866 = vmatpush3.bf16.msra.mxu1 %v3865_v23  ;;  %v1834_v23 = vld [vmem:[%s5414_s3 + $0x20] sm:$0xff] }
 0x5a8   : > { %3867 = vmatprep.subr.bf16.mxu1 %v4314_v1 }
 0x5ab   : > { %3869 = vmatpush3.bf16.msra.mxu1 %v3868_v25  ;;  %v3872_v25 = vpack.c.bf16 %v1834_v23, %v1830_v20 }
 0x5ac   : > { %3903 = vmatprep.subr.bf16.mxu1 %v4911_v43 }
 0x5ad   : > { %3873 = vmatpush1.bf16.msra.mxu0 %v3872_v25  ;;  %v1841_v25 = vld [vmem:[%s5414_s3 + $0x58] sm:$0xff] }
 0x661   : > { %v1717_v27 = vpop.f32.mrb[62].mxu1 }
 0x662   : > { %v1718_v28 = vadd.f32 %v3161_v26, %v1717_v27  ;;  %v3688_v29 = vpop.f32.mrb[63].mxu1  ;;  %v5035_v26 = vpack.c.bf16 %v1915_v41, %v1911_v24  ;;  %v1910_v27 = vld [vmem:[%s5414_s3 + $0x280] sm:$0xff]  ;;  %v1832_v24 = vld [vmem:[%s5414_s3 + $0x10] sm:$0xff] }
 0x663   : > { %v1839_v29 = vld [vmem:[%s5414_s3 + $0x48] sm:$0xff]  ;;  %v1836_v41 = vld [vmem:[%s5414_s3 + $0x30] sm:$0xff] }
 0x664   : > { %v1721_v31 = vmax.f32 %v1718_v28, 0.0  ;;  %v1914_v28 = vld [vmem:[%s5414_s3 + $0x2a0] sm:$0xff] }
 0x666   : > { %3722 = vmatmul.mubr.f32.vlgmr.msra.gmra.mrb[64].mxu1 %v1721_v31  ;;  %v5046_v31 = vpack.c.bf16 %v1914_v28, %v1910_v27  ;;  %v3888_v28 = vpack.c.bf16 %v1836_v41, %v1832_v24  ;;  %v1888_v24 = vld [vmem:[%s5414_s3 + $0x1d0] sm:$0xff] }
 0x667   : > { %2162 = vmatprep.mubr.f32.mxu1 %v4316_v4  ;;  %3905 = vmatpush1.bf16.msra.mxu1 %v4916_v46  ;;  %v1892_v41 = vld [vmem:[%s5414_s3 + $0x1f0] sm:$0xff] }
 0x668   : > { %3907 = vmatprep.subr.bf16.mxu1 %v4931_v55 }
 0x66b   : > { %3909 = vmatpush1.bf16.msra.mxu1 %v4939_v58 }
 0x66c   : > { %3911 = vmatprep.subr.bf16.mxu1 %v4949_v62 }
 0x66f   : > { %3913 = vmatpush1.bf16.msra.mxu1 %v4957_v5 }
 0x670   : > { %3915 = vmatprep.subr.bf16.mxu1 %v4967_v8 }
 0x673   : > { %3917 = vmatpush1.bf16.msra.mxu1 %v4975_v13 }
 0x676   : > { %2163 = vmatmul.mubr.f32.vlgmr.msra.gmra.mrb[66].mxu1 %v4316_v4 }
 0x677   : > { %2308 = vmatprep.mubr.f32.mxu1 %v4316_v4 }
 0x739   : > { %v1792_v33 = vpop.f32.mrb[64].mxu1 }
 0x73a   : > { %v1793_v34 = vadd.f32 %v3163_v32, %v1792_v33  ;;  %v3723_v35 = vpop.f32.mrb[65].mxu1  ;;  %v1843_v32 = vld [vmem:[%s5414_s3 + $0x68] sm:$0xff]  ;;  %v1838_v33 = vld [vmem:[%s5414_s3 + $0x40] sm:$0xff] }
 0x73b   : > { %v3874_v35 = vpack.c.bf16 %v1843_v32, %v1839_v29 }
 0x73c   : > { %v1796_v36 = vadd.f32 %v1793_v34, %v1615_v14  ;;  %v1895_v14 = vld [vmem:[%s5414_s3 + $0x208] sm:$0xff]  ;;  %v1842_v34 = vld [vmem:[%s5414_s3 + $0x60] sm:$0xff] }
 0x73d   : > { %v4985_v16 = vpack.c.bf16 %v1899_v15, %v1895_v14  ;;  %3875 = vmatprep.subr.bf16.mxu0 %v3874_v35  ;;  %v1849_v35 = vld [vmem:[%s5414_s3 + $0x98] sm:$0xff] }
 0x73e   : > { %v1798_v1 = vsel %vm1797_vm14, %v1796_v36, 0.0 }
 0x73f   : > { %1799 = vadd.xlane.f32.xlu0 %v1798_v1  ;;  %3935 = vmatprep.subr.bf16.mxu1 %v4985_v16  ;;  %v1919_v1 = vld [vmem:[%s5414_s3 + $0x2c8] sm:$0xff] }
 0x740   : > { %3937 = vmatpush1.bf16.msra.mxu1 %v4993_v12  ;;  %v5068_v42 = vpack.c.bf16 %v1923_v37, %v1919_v1 }
 0x741   : > { %3939 = vmatprep.subr.bf16.mxu1 %v5005_v59 }
 0x744   : > { %3941 = vmatpush1.bf16.msra.mxu1 %v5013_v63 }
 0x745   : > { %3943 = vmatprep.subr.bf16.mxu1 %v5035_v26 }
 0x748   : > { %3945 = vmatpush1.bf16.msra.mxu1 %v5046_v31 }
 0x749   : > { %3947 = vmatprep.subr.bf16.mxu1 %v5068_v42 }
 0x7cc   : > { %v1800_v47 = vpop.xlane.xlu0 %1799 }
 0x7cd   : > { %v1802_v48 = vmul.f32 0.015625, %v1800_v47  ;;  %v1847_v47 = vld [vmem:[%s5414_s3 + $0x88] sm:$0xff] }
 0x7cf   : > { %v4920_v49 = vsub.f32 %v1796_v36, %v1802_v48  ;;  %v3876_v36 = vpack.c.bf16 %v1842_v34, %v1838_v33  ;;  %v1851_v48 = vld [vmem:[%s5414_s3 + $0xa8] sm:$0xff]  ;;  %v1840_v33 = vld [vmem:[%s5414_s3 + $0x50] sm:$0xff] }
 0x7d0   : > { %v1844_v34 = vld [vmem:[%s5414_s3 + $0x70] sm:$0xff] }
 0x7d1   : > { %v1804_v51 = vmul.f32 %v4920_v49, %v4920_v49  ;;  %3877 = vmatpush1.bf16.msra.mxu0 %v3876_v36  ;;  %v1853_v36 = vld [vmem:[%s5414_s3 + $0xb8] sm:$0xff]  ;;  %v3892_v1 = vpack.c.bf16 %v1844_v34, %v1840_v33  ;;  %v1900_v33 = vld [vmem:[%s5414_s3 + $0x230] sm:$0xff] }
 0x7d2   : > { %v3894_v37 = vpack.c.bf16 %v1853_v36, %v1849_v35  ;;  %v1905_v34 = vld [vmem:[%s5414_s3 + $0x258] sm:$0xff] }
 0x7d3   : > { %v1805_v52 = vsel %vm1797_vm14, %v1804_v51, 0.0  ;;  %v5079_v51 = vpack.c.bf16 %v1922_v45, %v1918_v38  ;;  %v1848_v38 = vld [vmem:[%s5414_s3 + $0x90] sm:$0xff]  ;;  %v1909_v35 = vld [vmem:[%s5414_s3 + $0x278] sm:$0xff] }
 0x7d4   : > { %1806 = vadd.xlane.f32.xlu0 %v1805_v52  ;;  %v3878_v52 = vpack.c.bf16 %v1851_v48, %v1847_v47  ;;  %v1852_v45 = vld [vmem:[%s5414_s3 + $0xb0] sm:$0xff]  ;;  %v1857_v47 = vld [vmem:[%s5414_s3 + $0xd8] sm:$0xff] }
 0x7d5   : > { %3949 = vmatpush1.bf16.msra.mxu1 %v5079_v51  ;;  %v1861_v48 = vld [vmem:[%s5414_s3 + $0xf8] sm:$0xff] }
 0x7d6   : > { %3879 = vmatprep.subr.bf16.mxu0 %v3878_v52  ;;  %3724 = vmatprep.subr.mxu1 %v4316_v4  ;;  %v3896_v52 = vpack.c.bf16 %v1852_v45, %v1848_v38  ;;  %v3898_v53 = vpack.c.bf16 %v1861_v48, %v1857_v47  ;;  %v1908_v38 = vld [vmem:[%s5414_s3 + $0x270] sm:$0xff]  ;;  %v1913_v45 = vld [vmem:[%s5414_s3 + $0x298] sm:$0xff] }
 0x7d7   : > { %3881 = vmatpush1.bf16.msra.mxu0 %v3880_v60  ;;  %v1869_v60 = vld [vmem:[%s5414_s3 + $0x138] sm:$0xff] }
 0x7d8   : > { %2309 = vmatmul.mubr.f32.vlgmr.msra.gmra.mrb[66].mxu1 %v4316_v4  ;;  %3883 = vmatprep.subr.bf16.mxu0 %v3882_v61  ;;  %v3900_v61 = vpack.c.bf16 %v1860_v56, %v1856_v54  ;;  %v5174_v0 = vpack.c.bf16 %v1869_v60, %v1865_v57  ;;  %v1917_v47 = vld [vmem:[%s5414_s3 + $0x2b8] sm:$0xff]  ;;  %v1916_v54 = vld [vmem:[%s5414_s3 + $0x2b0] sm:$0xff] }
 0x7d9   : > { %3726 = vmatprep.mubr.msk.f32.mxu1 %vm4315_vm0, %v4316_v4  ;;  %v1921_v56 = vld [vmem:[%s5414_s3 + $0x2d8] sm:$0xff] }
 0x7da   : > { %v1925_v57 = vld [vmem:[%s5414_s3 + $0x2f8] sm:$0xff] }
 0x7db   : > { %3885 = vmatpush1.bf16.msra.mxu0 %v3884_v6  ;;  %v1868_v6 = vld [vmem:[%s5414_s3 + $0x130] sm:$0xff] }
 0x7dc   : > { %3887 = vmatprep.subr.bf16.mxu0 %v3886_v11  ;;  %v3920_v11 = vpack.c.bf16 %v1868_v6, %v1864_v3  ;;  %v1920_v3 = vld [vmem:[%s5414_s3 + $0x2d0] sm:$0xff] }
 0x7dd   : > { %v1924_v6 = vld [vmem:[%s5414_s3 + $0x2f0] sm:$0xff] }
 0x861   : > { %v1807_v14 = vpop.xlane.xlu0 %1806 }
 0x862   : > { %v1808_v15 = vmul.f32 0.015873017, %v1807_v14  ;;  %v3922_v14 = vpack.c.bf16 %v1877_v10, %v1873_v7  ;;  %v5288_v7 = vpack.c.bf16 %v1924_v6, %v1920_v3 }
 0x864   : > { %4174 = vrsqrt.f32 %v1808_v15  ;;  %vm1811_vm15 = vcmp.eq.f32.partialorder %v1808_v15, inf  ;;  %v1814_v21 = vand.u32 2147483648, %v1808_v15  ;;  %vm1813_vm1 = vcmp.eq.f32.partialorder %v1808_v15, 0.0 }
 0x86e   : > { %v4175_v17 = vpop.eup %4174 }
 0x86f   : > { %v1810_v18 = vmul.f32 %v4175_v17, %v1808_v15  ;;  %v1876_v17 = vld [vmem:[%s5414_s3 + $0x170] sm:$0xff] }
 0x871   : > { %v1812_v30 = vsel %vm1811_vm15, %v1808_v15, %v1810_v18  ;;  %v1872_v15 = vld [vmem:[%s5414_s3 + $0x150] sm:$0xff]  ;;  %v1881_v18 = vld [vmem:[%s5414_s3 + $0x198] sm:$0xff] }
 0x872   : > { %v1815_v9 = vsel %vm1813_vm1, %v1814_v21, %v1812_v30  ;;  %v1885_v21 = vld [vmem:[%s5414_s3 + $0x1b8] sm:$0xff]  ;;  %v3924_v30 = vpack.c.bf16 %v1876_v17, %v1872_v15 }
 0x873   : > { %v1816_v44 = vadd.f32 0.001, %v1815_v9  ;;  %v3926_v9 = vpack.c.bf16 %v1885_v21, %v1881_v18 }
 0x875   : > { %4176 = vrcp.f32 %v1816_v44  ;;  %v1880_v44 = vld [vmem:[%s5414_s3 + $0x190] sm:$0xff] }
 0x87f   : > { %v4177_v40 = vpop.eup %4176 }
 0x880   : > { %v1818_v20 = vmul.f32 %v4177_v40, %v4920_v49  ;;  %v1845_v49 = vld [vmem:[%s5414_s3 + $0x78] sm:$0xff]  ;;  %v1884_v40 = vld [vmem:[%s5414_s3 + $0x1b0] sm:$0xff] }
 0x881   : > { %v3890_v32 = vpack.c.bf16 %v1845_v49, %v1841_v25  ;;  %v1897_v25 = vld [vmem:[%s5414_s3 + $0x218] sm:$0xff] }
 0x882   : > { %v1823_v23 = vmul.f32 %v3164_v19, %v1818_v20  ;;  %v1889_v19 = vld [vmem:[%s5414_s3 + $0x1d8] sm:$0xff] }
 0x883   : > { %v1893_v20 = vld [vmem:[%s5414_s3 + $0x1f8] sm:$0xff] }
 0x884   : > { %v5128_v27 = vadd.f32 %v3165_v22, %v1823_v23  ;;  %v3928_v22 = vpack.c.bf16 %v1884_v40, %v1880_v44  ;;  %v3930_v23 = vpack.c.bf16 %v1893_v20, %v1889_v19  ;;  %v1901_v49 = vld [vmem:[%s5414_s3 + $0x238] sm:$0xff] }
 0x886   : > { %1829 = vst.msk [vmem:[%s265_s17] sm:$0x7f] %vm1797_vm14, %v5128_v27  ;;  %3725 = vmatpush3.xpose.msk.msra.mxu1 %vm884_vm2, %v5128_v27  ;;  %v1950_v29 = vrot.slane %v5128_v27, 3  ;;  %s3184_s17 = sshll.u32 %s4372_s22, 6  ;;  %s4320_s22 = smov [#allocation6]  }
 0x887   : > { %3729 = vmatprep.subr.mxu1 %v4316_v4  ;;  %s5366_s30 = scalar_lea.hbm %s5415_s4, %s3184_s17 }
 0x888   : > { %3167 = vmatmul.mubr.msk.f32.vlgmr.msra.gmra.mrb[64].mxu0 %vm884_vm2, %v1950_v29 }
 0x889   : > { %3889 = vmatpush1.bf16.msra.mxu0 %v3888_v28  ;;  %2088 = vmatprep.mubr.f32.mxu0 %v4316_v4  ;;  %v3932_v28 = vpack.c.bf16 %v1892_v41, %v1888_v24 }
 0x88a   : > { %3891 = vmatprep.subr.bf16.mxu0 %v3890_v32  ;;  %v1896_v32 = vld [vmem:[%s5414_s3 + $0x210] sm:$0xff] }
 0x88b   : > { %v5239_v36 = vpack.c.bf16 %v1900_v33, %v1896_v32 }
 0x88d   : > { %3893 = vmatpush1.bf16.msra.mxu0 %v3892_v1  ;;  %v5241_v1 = vpack.c.bf16 %v1909_v35, %v1905_v34 }
 0x88e   : > { %3895 = vmatprep.subr.bf16.mxu0 %v3894_v37  ;;  %v1904_v37 = vld [vmem:[%s5414_s3 + $0x250] sm:$0xff] }
 0x88f   : > { %v5257_v48 = vpack.c.bf16 %v1908_v38, %v1904_v37 }
 0x891   : > { %3897 = vmatpush1.bf16.msra.mxu0 %v3896_v52  ;;  %v5261_v52 = vpack.c.bf16 %v1917_v47, %v1913_v45 }
 0x892   : > { %3899 = vmatprep.subr.bf16.mxu0 %v3898_v53  ;;  %v1912_v53 = vld [vmem:[%s5414_s3 + $0x290] sm:$0xff] }
 0x893   : > { %v5276_v60 = vpack.c.bf16 %v1916_v54, %v1912_v53 }
 0x895   : > { %3901 = vmatpush1.bf16.msra.mxu0 %v3900_v61  ;;  %v5279_v61 = vpack.c.bf16 %v1925_v57, %v1921_v56 }
 0x896   : > { %3919 = vmatprep.subr.bf16.mxu0 %v5174_v0 }
 0x898   : > { %3168 = vmatmul.mubr.msk.f32.vlgmr.msra.gmra.mrb[66].mxu0 %vm884_vm2, %v1950_v29  ;;  %v3950_v29 = vpack.c.bf16 %v1901_v49, %v1897_v25 }
 0x899   : > { %3921 = vmatpush1.bf16.msra.mxu0 %v3920_v11  ;;  %2233 = vmatprep.mubr.f32.mxu0 %v4316_v4 }
 0x89a   : > { %3923 = vmatprep.subr.bf16.mxu0 %v3922_v14 }
 0x89d   : > { %3925 = vmatpush1.bf16.msra.mxu0 %v3924_v30 }
 0x89e   : > { %3927 = vmatprep.subr.bf16.mxu0 %v3926_v9 }
 0x8a1   : > { %3929 = vmatpush1.bf16.msra.mxu0 %v3928_v22 }
 0x8a2   : > { %3931 = vmatprep.subr.bf16.mxu0 %v3930_v23 }
 0x8a5   : > { %3933 = vmatpush1.bf16.msra.mxu0 %v3932_v28 }
 0x8a6   : > { %3951 = vmatprep.subr.bf16.mxu0 %v3950_v29 }
 0x8a8   : > { %2234 = vmatmul.mubr.f32.vlgmr.msra.gmra.mrb[68].mxu0 %v4316_v4 }
 0x8a9   : > { %3953 = vmatpush1.bf16.msra.mxu0 %v5239_v36  ;;  %2379 = vmatprep.mubr.f32.mxu0 %v4316_v4 }
 0x8aa   : > { %3955 = vmatprep.subr.bf16.mxu0 %v5241_v1 }
 0x8ab   : > { %v2310_v10 = vpop.f32.mrb[66].mxu1 }
 0x8ac   : > { %v2312_v15 = vpop.f32.mrb[67].mxu1 }
 0x8ad   : > { %3957 = vmatpush1.bf16.msra.mxu0 %v5257_v48 }
 0x8ae   : > { %3959 = vmatprep.subr.bf16.mxu0 %v5261_v52 }
 0x8b1   : > { %3961 = vmatpush1.bf16.msra.mxu0 %v5276_v60 }
 0x8b2   : > { %3963 = vmatprep.subr.bf16.mxu0 %v5279_v61 }
 0x8b5   : > { %3965 = vmatpush1.bf16.msra.mxu0 %v5288_v7 }
 0x8b6   : > { %3983 = vmatprep.subr.bf16.mxu0 %v5174_v0  ;;  %v3166_v0 = vld [vmem:[%s5414_s3 + $0x300] ss:$8 sm:$0xf] }
 0x8b8   : > { %2380 = vmatmul.mubr.f32.vlgmr.msra.gmra.mrb[68].mxu0 %v4316_v4 }
 0x8b9   : > { %3985 = vmatpush1.bf16.msra.mxu0 %v3920_v11  ;;  %2718 = vmatprep.mubr.f32.mxu0 %v4316_v4  ;;  %v1936_v11 = vrot.slane %v3166_v0, %v1514_v50  ;;  %v1943_v50 = vsub.s32 3, %v4856_v2 }
 0x8ba   : > { %3987 = vmatprep.subr.bf16.mxu0 %v3922_v14  ;;  %v1932_v14 = vrot.slane %v3166_v0, %v1422_v39 }
 0x8bb   : > { %v1944_v25 = vrot.slane %v3166_v0, %v1943_v50 }
 0x8bd   : > { %3989 = vmatpush1.bf16.msra.mxu0 %v3924_v30 }
 0x8be   : > { %3991 = vmatprep.subr.bf16.mxu0 %v3926_v9 }
 0x8c1   : > { %3993 = vmatpush1.bf16.msra.mxu0 %v3928_v22 }
 0x8c2   : > { %3995 = vmatprep.subr.bf16.mxu0 %v3930_v23  ;;  %v1939_v23 = vsub.s32 2, %v4856_v2 }
 0x8c4   : > { %v1940_v39 = vrot.slane %v3166_v0, %v1939_v23 }
 0x8c5   : > { %3997 = vmatpush1.bf16.msra.mxu0 %v3932_v28 }
 0x8c6   : > { %4015 = vmatprep.subr.bf16.mxu0 %v3950_v29 }
 0x95b   : > { %v2019_v17 = vpop.f32.mrb[64].mxu0 }
 0x95c   : > { %v2021_v18 = vpop.f32.mrb[65].mxu0  ;;  %v5304_v44 = vadd.f32 %v2019_v17, %v1932_v14 }
 0x95d   : > { %v5302_v9 = vadd.f32 %v2021_v18, %v1936_v11 }
 0x95e   : > { %v4030_v19 = vadd.f32 %v2310_v10, %v5304_v44 }
 0x95f   : > { %v4031_v40 = vadd.f32 %v2312_v15, %v5302_v9 }
 0x960   : > { %v3169_v22 = vmul.f32 -1.442695, %v4030_v19 }
 0x961   : > { %v3170_v20 = vmul.f32 -1.442695, %v4031_v40 }
 0x963   : > { %4178 = vpow2.f32 %v3170_v20 }
 0x964   : > { %4180 = vpow2.f32 %v3169_v22 }
 0x96b   : > { %v2090_v21 = vpop.f32.mrb[66].mxu0 }
 0x96c   : > { %v2092_v30 = vpop.f32.mrb[67].mxu0  ;;  %v5310_v29 = vadd.f32 %v2090_v21, %v1940_v39 }
 0x96d   : > { %v4179_v24 = vpop.eup %4178  ;;  %v5312_v32 = vadd.f32 %v2092_v30, %v1944_v25 }
 0x96e   : > { %v4181_v41 = vpop.eup %4180  ;;  %v2399_v49 = vadd.f32 1.0, %v4179_v24 }
 0x96f   : > { %v2393_v28 = vadd.f32 1.0, %v4181_v41 }
 0x970   : > { %4182 = vrcp.f32 %v2399_v49 }
 0x971   : > { %4184 = vrcp.f32 %v2393_v28 }
 0x97a   : > { %v4183_v38 = vpop.eup %4182 }
 0x97b   : > { %v4185_v45 = vpop.eup %4184  ;;  %v2409_v53 = vmul.f32 0.0, %v4183_v38 }
 0x98b   : > { %v2381_v33 = vpop.f32.mrb[68].mxu0 }
 0x98c   : > { %v4032_v34 = vadd.f32 %v2381_v33, %v5310_v29  ;;  %v2383_v35 = vpop.f32.mrb[69].mxu0 }
 0x98d   : > { %v4033_v37 = vadd.f32 %v2383_v35, %v5312_v32 }
 0x98e   : > { %4186 = vtanh.f32 %v4032_v34 }
 0x98f   : > { %v3171_v2 = vmul.f32 -1.442695, %v4033_v37 }
 0x991   : > { %4188 = vpow2.f32 %v3171_v2 }
 0x998   : > { %v4187_v47 = vpop.eup %4186 }
 0x999   : > { %v2410_v54 = vmul.f32 %v4187_v47, %v4185_v45 }
 0x99b   : > { %v4189_v56 = vpop.eup %4188  ;;  %v5316_v57 = vadd.f32 %v2410_v54, %v2409_v53 }
 0x99c   : > { %v2406_v3 = vadd.f32 1.0, %v4189_v56 }
 0x99d   : > { %4190 = vtanh.f32 %v5316_v57 }
 0x99e   : > { %4192 = vrcp.f32 %v2406_v3 }
 0x9a7   : > { %v4191_v6 = vpop.eup %4190 }
 0x9a8   : > { %v4193_v10 = vpop.eup %4192 }
 0x9a9   : > { %v2413_v15 = vmul.f32 %v4193_v10, %v4191_v6 }
 0x9ab   : > { %v2415_v17 = vrot.slane %v2413_v15, 5 }
 0x9ad   : > { %v2417_v18 = vadd.f32 %v2415_v17, %v5128_v27 }
 0x9af   : > { %v2419_v0 = vrot.slane %v2417_v18, 3 }
 0x9b1   : > { %3727 = vmatmul.mubr.msk.f32.vlgmr.msra.gmra.mrb[68].mxu1 %vm884_vm2, %v2419_v0  ;;  %3177 = vmatmul.mubr.msk.f32.vlgmr.msra.gmra.mrb[70].mxu0 %vm884_vm2, %v2419_v0 }
 0x9b2   : > { %3730 = vmatpush3.msk.msra.mxu1 %vm2510_vm3, %v5128_v27  ;;  %3731 = vmatprep.mubr.msk.f32.mxu1 %vm4315_vm0, %v4316_v4  ;;  %vm2506_vm0 = vcmask 23552  }
 0x9b3   : > { %3967 = vmatprep.subr.bf16.mxu1 %v4911_v43  ;;  %4017 = vmatpush1.bf16.msra.mxu0 %v5239_v36 }
 0x9b4   : > { %4019 = vmatprep.subr.bf16.mxu0 %v5241_v1  ;;  %2867 = vmatprep.mubr.f32.mxu0 %v4316_v4 }
 0x9b7   : > { %4021 = vmatpush1.bf16.msra.mxu0 %v5257_v48 }
 0x9b8   : > { %4023 = vmatprep.subr.bf16.mxu0 %v5261_v52 }
 0x9bb   : > { %4025 = vmatpush1.bf16.msra.mxu0 %v5276_v60 }
 0x9bc   : > { %4027 = vmatprep.subr.bf16.mxu0 %v5279_v61 }
 0x9bf   : > { %4029 = vmatpush1.bf16.msra.mxu0 %v5288_v7 }
 0xa84   : > { %v2490_v11 = vpop.f32.mrb[68].mxu1 }
 0xa85   : > { %v3728_v21 = vpop.f32.mrb[69].mxu1  ;;  %v2495_v43 = vsel %vm2494_vm4, %v2490_v11, -inf }
 0xa86   : > { %2496 = vmax.xlane.f32.xlu0 %v2495_v43 }
 0xb13   : > { %v2497_v36 = vpop.xlane.xlu0 %2496 }
 0xb14   : > { %v2498_v14 = vsub.f32 %v2490_v11, %v2497_v36 }
 0xb16   : > { %v2499_v1 = vmul.f32 1.442695, %v2498_v14 }
 0xb18   : > { %4194 = vpow2.f32 %v2499_v1 }
 0xb22   : > { %v4195_v30 = vpop.eup %4194 }
 0xb23   : > { %v2501_v40 = vsel %vm2494_vm4, %v4195_v30, 0.0 }
 0xb24   : > { %2502 = vadd.xlane.f32.xlu0 %v2501_v40 }
 0xbb1   : > { %v2503_v48 = vpop.xlane.xlu0 %2502 }
 0xbb2   : > { %4196 = vrcp.f32 %v2503_v48 }
 0xbbc   : > { %v4197_v52 = vpop.eup %4196 }
 0xbbd   : > { %v2505_v60 = vmul.f32 %v4197_v52, %v4195_v30 }
 0xbbf   : > { %3732 = vmatmul.mubr.msk.f32.vlgmr.msra.gmra.mrb[70].mxu1 %vm2506_vm0, %v2505_v60 }
 0xbc0   : > { %3969 = vmatpush1.bf16.msra.mxu1 %v4916_v46  ;;  %2647 = vmatprep.mubr.f32.mxu1 %v4316_v4 }
 0xbc1   : > { %3971 = vmatprep.subr.bf16.mxu1 %v4931_v55 }
 0xbc4   : > { %3973 = vmatpush1.bf16.msra.mxu1 %v4939_v58 }
 0xbc5   : > { %3975 = vmatprep.subr.bf16.mxu1 %v4949_v62 }
 0xbc8   : > { %3977 = vmatpush1.bf16.msra.mxu1 %v4957_v5 }
 0xbc9   : > { %3979 = vmatprep.subr.bf16.mxu1 %v4967_v8 }
 0xbcc   : > { %3981 = vmatpush1.bf16.msra.mxu1 %v4975_v13 }
 0xbcd   : > { %3999 = vmatprep.subr.bf16.mxu1 %v4985_v16 }
 0xbcf   : > { %3176 = vmatmul.mubr.msk.f32.vlgmr.msra.gmra.mrb[72].mxu1 %vm884_vm2, %v2419_v0 }
 0xbd0   : > { %4001 = vmatpush1.bf16.msra.mxu1 %v4993_v12  ;;  %2796 = vmatprep.mubr.f32.mxu1 %v4316_v4 }
 0xbd1   : > { %4003 = vmatprep.subr.bf16.mxu1 %v5005_v59 }
 0xbd4   : > { %4005 = vmatpush1.bf16.msra.mxu1 %v5013_v63 }
 0xbd5   : > { %4007 = vmatprep.subr.bf16.mxu1 %v5035_v26 }
 0xbd8   : > { %4009 = vmatpush1.bf16.msra.mxu1 %v5046_v31 }
 0xbd9   : > { %4011 = vmatprep.subr.bf16.mxu1 %v5068_v42 }
 0xbdc   : > { %4013 = vmatpush1.bf16.msra.mxu1 %v5079_v51 }
 0xc92   : > { %v2579_v46 = vpop.f32.mrb[70].mxu1 }
 0xc93   : > { %v3733_v55 = vpop.f32.mrb[71].mxu1  ;;  %3178 = vmatmul.mubr.msk.f32.vlgmr.msra.gmra.mrb[72].mxu1 %vm884_vm2, %v2579_v46  ;;  %3179 = vmatmul.mubr.msk.f32.vlgmr.msra.gmra.mrb[70].mxu0 %vm884_vm2, %v2579_v46  ;;  %vm2910_vm2 = vcmask 1047043  }
 0xd66   : > { %v2798_v58 = vpop.f32.mrb[72].mxu1  ;;  %v2869_v4 = vpop.f32.mrb[70].mxu0 }
 0xd67   : > { %v4034_v62 = vadd.f32 %v2798_v58, %v5304_v44  ;;  %v2800_v5 = vpop.f32.mrb[73].mxu1  ;;  %v2871_v8 = vpop.f32.mrb[71].mxu0  ;;  %v4036_v26 = vadd.f32 %v2869_v4, %v5310_v29 }
 0xd68   : > { %v4035_v13 = vadd.f32 %v2800_v5, %v5302_v9  ;;  %v4037_v59 = vadd.f32 %v2871_v8, %v5312_v32 }
 0xd69   : > { %v3180_v16 = vmul.f32 -1.442695, %v4034_v62 }
 0xd6a   : > { %v3181_v12 = vmul.f32 -1.442695, %v4035_v13  ;;  %v3182_v63 = vmul.f32 -1.442695, %v4037_v59 }
 0xd6b   : > { %4198 = vpow2.f32 %v3180_v16 }
 0xd6c   : > { %4200 = vpow2.f32 %v3181_v12 }
 0xd6d   : > { %4202 = vpow2.f32 %v3182_v63 }
 0xd6e   : > { %4204 = vtanh.f32 %v4036_v26 }
 0xd75   : > { %v4199_v31 = vpop.eup %4198 }
 0xd76   : > { %v4201_v42 = vpop.eup %4200  ;;  %v2881_v51 = vadd.f32 1.0, %v4199_v31 }
 0xd77   : > { %v2887_v61 = vadd.f32 1.0, %v4201_v42  ;;  %v4203_v7 = vpop.eup %4202 }
 0xd78   : > { %4206 = vrcp.f32 %v2881_v51  ;;  %v4205_v9 = vpop.eup %4204  ;;  %v2894_v22 = vadd.f32 1.0, %v4203_v7 }
 0xd79   : > { %4208 = vrcp.f32 %v2887_v61 }
 0xd7a   : > { %4210 = vrcp.f32 %v2894_v22 }
 0xd82   : > { %v4207_v44 = vpop.eup %4206 }
 0xd83   : > { %v4209_v19 = vpop.eup %4208  ;;  %v2898_v20 = vmul.f32 %v4207_v44, %v4205_v9 }
 0xd84   : > { %v2897_v23 = vmul.f32 %v4209_v19, %v5316_v57  ;;  %v4211_v24 = vpop.eup %4210 }
 0xd86   : > { %v2899_v50 = vadd.f32 %v2898_v20, %v2897_v23 }
 0xd88   : > { %4212 = vtanh.f32 %v2899_v50 }
 0xd92   : > { %v4213_v41 = vpop.eup %4212 }
 0xd93   : > { %v2901_v39 = vmul.f32 %v4213_v41, %v4211_v24 }
 0xd95   : > { %v2903_v25 = vrot.slane %v2901_v39, 5 }
 0xd97   : > { %v2905_v49 = vadd.f32 %v2903_v25, %v5128_v27 }
 0xd99   : > { %2907 = vrot.lane.b32.xlu1 %v2905_v49, %s4318_s10  ;;  %s4246_s10 = sshll.u32 %s4320_s22, 4  ;;  %s4247_s10 = int_to_ptr.vmem [resolvable:$false] %s4246_s10 }
 0xd9a   : > { %s4248_s9 = scalar_lea.vmem %s4247_s10, 128  ;;  %p4249_p2 = scmp.lt.s32.totalorder %s5368_s25, %s4247_s10 }
 0xd9b   : > { %p4250_p3 = scmp.lt.s32.totalorder %s4248_s9, %s4242_s8 }
 0xd9d   : > { %p4251_p4 = por %p4250_p3, %p4249_p2 }
 0xd9f   : > { %p4252_p7 = pnand %p4251_p4, %p4245_p12 }
 0xe0b   : > { %v2908_v28 = vpop.permute.xlu1 %2907 }
 0xe0c   : > { %2911 = vst.msk [vmem:[%s4886_s23 - $0x3] sm:$0x78] %vm2910_vm2, %v2908_v28 }
 0xe0d   : > { %4255 = shalt.err (!%p4252_p7)
}
 0xe0e   : > { %s4256_s15 = scalar_lea.hbm %s5366_s30, 64  ;;  %s4260_s12 = scalar_lea.hbm %s5415_s4, 512 }
 0xe0f   : > { %p4257_p8 = scmp.ne.s32.totalorder %s5366_s30, %s4256_s15  ;;  %p4261_p1 = scmp.lt.u32.totalorder %s5366_s30, %s5415_s4 }
 0xe10   : > { %p4262_p0 = scmp.lt.u32.totalorder %s4260_s12, %s4256_s15  ;;  %p4264_p6 = scmp.lt.u32.totalorder %s4256_s15, %s5366_s30 }
 0xe11   : > { %p4258_p11 = pnand %p4257_p8, %p5429_p9 }
 0xe12   : > { %p4263_p5 = por %p4262_p0, %p4261_p1 }
 0xe13   : > { %p4259_p13 = pneg %p4258_p11 }
 0xe14   : > { %p4265_p10 = por %p4264_p6, %p4263_p5 }
 0xe16   : > { %p4266_p12 = pnand %p4265_p10, %p4259_p13 }
 0xe18   : > { %4269 = shalt.err (!%p4266_p12)
}
 0xe19   : > { %4051 = dma.vmem_to_hbm [thread:$0]  (%p5429_p9), %s5368_s25, 64, %s5366_s30, %s2913_s7  }
 0xe1a PF: > { %p4063_p2 = scmp.ge.s32.totalorder %s4308_s21, 2  ;;  %s2945_s16 = sand.u32 1, %s4296_s18  }
 0xe1b   : > { %p5430_p3 = scmp.ne.s32.totalorder %s5421_s29, 0  ;;  %s2946_s17 = scalar_lea.sflag [#allocation5], %s2945_s16 }
 0xe1d   : > { %p4058_p4 = pnand %p4063_p2, %p5430_p3 }
 0xe1f   : > { %4291 = dma.done.wait (!%p4058_p4), %s2946_s17, 64  }
 0xe20   : > { %4293 = vsyncadd (!%p4058_p4), %s2946_s17, 4294967232  ;;  %p17_p7 = scmp.ge.s32.totalorder %s4376_s24, 10   ;;  %s5431_s18 = smov %s4300_s19 }
 0xe21   : > { %s5432_s19 = smov %s4304_s20  ;;  %s5433_s20 = smov %s4387_s27 }
 0xe22   : > { %s5434_s21 = smov %s4376_s24  ;;  %19 = sbr.rel (!%p17_p7) target bundleno = 4 (0x4), region = 92 }
 0xe29   :  { %2958 = vsyncpa [#allocation4], 1 }
 0xe2a   :  { %2960 = vsyncpa [#allocation4 + $0x1], 1 }
 0xe2b   :  { %2961 = vsyncpa [#allocation5], 1 }
 0xe2c   :  { %2963 = vsyncpa [#allocation5 + $0x1], 1 }

</bundles_post_ra>
